<compile_context>
chip_gen: v7x
topology: tpu7x:2x2x1
jax: 0.10.0
libtpu: 0.0.40
codegen_flags: <defaults>
</compile_context>

<pallas_src>
import functools
import math

import jax
import jax.numpy as jnp
from jax.experimental import pallas as pl
from jax.experimental.pallas import tpu as pltpu


def _round_up(v, m):
    return ((v + m - 1) // m) * m


# ----------------------------------------------------------------------------
# Fused Pallas kernel: the whole deformation MLP for one (head, point-tile).
# ----------------------------------------------------------------------------
def _fused_meta_mlp_kernel(*refs, n_layers, cond_dim, fout_pads,
                           post_scale, post_shift, mxu_dtype):
    # refs = (xc_ref, W_0, ..., W_{L-1}, B_rest, o_ref)
    assert len(refs) == n_layers + 3
    xc_ref = refs[0]
    w_refs = refs[1:1 + n_layers]
    brest_ref = refs[1 + n_layers]
    o_ref = refs[-1]
    C = cond_dim

    # (C + 1 + fin0, TN) block; rows = [cond (C), ones (1), x_scaled (+additional)].
    xc = xc_ref[0].astype(jnp.float32)
    cond_aug = xc[:C + 1, :]                        # sublane-aligned (offset 0)
    # Hoisted once: per-channel cond rows reused by every layer's combine loop.
    cond_rows = [cond_aug[c:c + 1, :] for c in range(C)]

    # ONE small K=C+1 MXU matmul per tile providing the x-bias-column contribution
    # of all layers >= 1 (layer 0's bias is folded into its main weight).
    bias_all = jnp.dot(brest_ref[0].astype(mxu_dtype), cond_aug.astype(mxu_dtype),
                       preferred_element_type=jnp.float32)   # (sum fp_{l>=1}, TN)

    act = xc                                        # layer-0 augmented activation
    boff = 0
    for l in range(n_layers):
        fp = fout_pads[l]
        w = w_refs[l][0]                            # ((C+1)*fp, fin_cols_l)

        # MXU: every (cond-channel, output) pair at once; points on the lane axis.
        t = jnp.dot(w.astype(mxu_dtype), act.astype(mxu_dtype),
                    preferred_element_type=jnp.float32)       # ((C+1)*fp, TN)

        # The ones-channel slice already carries the cond-independent term (and the
        # folded hyper-net bias for layer 0).
        acc0 = t[C * fp:(C + 1) * fp, :]
        if l > 0:
            acc0 = acc0 + bias_all[boff:boff + fp, :]
            boff += fp

        # VPU combine over cond channels: sublane-aligned slices (fp % 8 == 0),
        # stride-0 sublane broadcasts of the cond rows, two independent
        # accumulators to break the serial dependency chain.
        acc1 = None
        for c in range(C):
            term = cond_rows[c] * t[c * fp:(c + 1) * fp, :]
            if c % 2 == 0:
                acc0 = acc0 + term
            elif acc1 is None:
                acc1 = term
            else:
                acc1 = acc1 + term
        act = acc0 if acc1 is None else acc0 + acc1

        if l < n_layers - 1:
            act = jnp.maximum(act, 0.0)             # fused ReLU

    if post_scale != 1.0 or post_shift != 0.0:
        act = act * post_scale + post_shift         # fused output affine
    o_ref[0] = act.astype(o_ref.dtype)


# ----------------------------------------------------------------------------
# Wrapper: layout transform + pallas_call.
# ----------------------------------------------------------------------------
def fused_meta_mlp_pallas(x, cond, additional, kernel_w, kernel_b_rest, fout_pads,
                          *, out_dim, pre_scale=1.0, pre_shift=0.0,
                          post_scale=1.0, post_shift=0.0,
                          tile_n=2048, mxu_dtype=jnp.float32):
    """x: (H, N, in_dim); cond: (H, N, C); additional: (H, N, add_dim) or None."""
    H, N, _ = x.shape
    C = cond.shape[-1]
    n_layers = len(kernel_w)
    dt = x.dtype

    # Lane-dense point tile (N lives on the 128-lane axis).
    tile = max(128, _round_up(int(tile_n), 128))
    tile = min(tile, _round_up(N, 128))
    n_tiles = pl.cdiv(N, tile)
    n_pad = n_tiles * tile

    # Build the fused lane-dense input (H, C+1+fin0, n_pad) = [cond; 1; x'; add] in
    # one wrapper pass (pre-affine, concat, transpose and tail-pad all fuse into the
    # single materialization of xc under jit).
    if pre_scale != 1.0 or pre_shift != 0.0:
        xs = x * jnp.asarray(pre_scale, dt) + jnp.asarray(pre_shift, dt)
    else:
        xs = x
    pieces = [cond.astype(dt), jnp.ones((H, N, 1), dt), xs]
    if additional is not None:
        pieces.append(additional.astype(dt))
    xc = jnp.swapaxes(jnp.concatenate(pieces, axis=-1), 1, 2)   # (H, F_aug, N)
    if n_pad != N:
        xc = jnp.pad(xc, ((0, 0), (0, 0), (0, n_pad - N)))

    fin_aug = xc.shape[1]
    out_pad = fout_pads[-1]

    in_specs = [pl.BlockSpec((1, fin_aug, tile), lambda h, n: (h, 0, n))]
    args = [xc]
    for W in kernel_w:
        # Whole per-head weight block; constant along the N axis -> stays resident.
        in_specs.append(pl.BlockSpec((1,) + W.shape[1:], lambda h, n: (h, 0, 0)))
        args.append(W)
    in_specs.append(pl.BlockSpec((1,) + kernel_b_rest.shape[1:],
                                 lambda h, n: (h, 0, 0)))
    args.append(kernel_b_rest)

    kernel = functools.partial(
        _fused_meta_mlp_kernel,
        n_layers=n_layers, cond_dim=C,
        fout_pads=tuple(int(f) for f in fout_pads),
        post_scale=float(post_scale), post_shift=float(post_shift),
        mxu_dtype=mxu_dtype)

    out_t = pl.pallas_call(
        kernel,
        out_shape=jax.ShapeDtypeStruct((H, out_pad, n_pad), dt),
        grid_spec=pltpu.PrefetchScalarGridSpec(
            num_scalar_prefetch=0,
            grid=(H, n_tiles),
            in_specs=in_specs,
            out_specs=pl.BlockSpec((1, out_pad, tile), lambda h, n: (h, 0, n)),
        ),
        compiler_params=pltpu.CompilerParams(
            dimension_semantics=("parallel", "parallel"),
            # A few MB actually used at tile_n=2048; 32 MB is safe on v5e/v6e/v7x
            # (v7x VMEM is 64 MiB/TC -- keep this <= ~48 MB there).
            vmem_limit_bytes=32 * 1024 * 1024),
    )(*args)

    # Back to the module's (H, N, out_dim) layout; dropping the tail pad and the
    # padded output rows is folded into this same transpose pass.
    return jnp.swapaxes(out_t, 1, 2)[:, :N, :out_dim]


# ----------------------------------------------------------------------------
# Parameter permutation: PyTorch layout -> kernel layout, done once in __init__.
# ----------------------------------------------------------------------------
def _layer_to_kernel_layout(cw, cb, fin, fout, cond_dim, fin_cols, fout_pad,
                            x_col_off, fold_bias):
    """cw: (H, fout*(fin+1), C), flat row d = o*(fin+1)+i ; cb: (H, fout*(fin+1)).

    Returns:
      W: (H, (C+1)*fout_pad, fin_cols)   row r = c*fout_pad + o;
         columns [x_col_off : x_col_off+fin] hold w[o,i,c] (c<C) / cbias[o,i] (c=C).
         If fold_bias, the ones-channel rows (c=C) additionally carry the x-bias
         column: w[o,fin,c'] -> column c', cbias[o,fin] -> column C.
      B: (H, fout_pad, C+1)              the x-bias column (used when not folded).
    """
    H = cw.shape[0]
    C = cond_dim
    cw_r = cw.reshape(H, fout, fin + 1, C)           # [h, o, i, c]
    cb_r = cb.reshape(H, fout, fin + 1)              # [h, o, i]

    W = jnp.zeros((H, C + 1, fout_pad, fin_cols), jnp.float32)
    W = W.at[:, :C, :fout, x_col_off:x_col_off + fin].set(
        jnp.transpose(cw_r[:, :, :fin, :], (0, 3, 1, 2)))        # [h, c, o, i]
    W = W.at[:, C, :fout, x_col_off:x_col_off + fin].set(cb_r[:, :, :fin])
    if fold_bias:
        W = W.at[:, C, :fout, 0:C].set(cw_r[:, :, fin, :])       # [h, o, c]
        W = W.at[:, C, :fout, C].set(cb_r[:, :, fin])
    W = W.reshape(H, (C + 1) * fout_pad, fin_cols)

    B = jnp.zeros((H, fout_pad, C + 1), jnp.float32)
    B = B.at[:, :fout, :C].set(cw_r[:, :, fin, :])
    B = B.at[:, :fout, C].set(cb_r[:, :, fin])
    return W, B


# ----------------------------------------------------------------------------
# Pure-JAX reference for one MetaMultiLinear layer (mirrors the PyTorch code).
# ----------------------------------------------------------------------------
def meta_multi_linear_ref(x, cond, cond_weight, cond_bias):
    H, N, fin = x.shape
    D = cond_weight.shape[1]
    out_features = D // (fin + 1)
    weight = jnp.einsum('hnc,hdc->hnd', cond, cond_weight) + cond_bias[:, None, :]
    weight = weight.reshape(H, N, out_features, fin + 1)
    xp = jnp.concatenate([x, jnp.ones((H, N, 1), x.dtype)], axis=-1)
    return jnp.einsum('hnoi,hni->hno', weight, xp)


# ----------------------------------------------------------------------------
# DeformationMetaMultiMLP
# ----------------------------------------------------------------------------
class DeformationMetaMultiMLP:
    """JAX/Pallas port of the PyTorch DeformationMetaMultiMLP (defaults:
    no positional encoding, ReLU hidden non-linearity, no final non-linearity)."""

    def __init__(self, key, n_heads, n_layer, layer_size, input_dim, cond_dim,
                 output_dim,
                 additional_input_dim=0,
                 data_input_range_min=None, data_input_range_max=None,
                 mlp_input_range_min=-1.0, mlp_input_range_max=1.0,
                 output_range_min=-1.0, output_range_max=1.0):
        assert n_layer >= 2
        self.n_heads = n_heads
        self.n_layer = n_layer
        self.layer_size = layer_size
        self.input_dim = input_dim
        self.cond_dim = cond_dim
        self.output_dim = output_dim
        self.additional_input_dim = additional_input_dim
        self.data_input_range_min = data_input_range_min
        self.data_input_range_max = data_input_range_max
        self.mlp_input_range_min = mlp_input_range_min
        self.mlp_input_range_max = mlp_input_range_max
        self.output_range_min = output_range_min
        self.output_range_max = output_range_max
        # TODO(synk): FrequencyPositionalEncoding branch not instantiated (default
        # positional_encoding=None); non-ReLU non_linearity / final_non_linearity
        # modules not supported (defaults implemented).

        first_fin = additional_input_dim + input_dim
        dims = [(first_fin, layer_size)]
        for _ in range(n_layer - 2):
            dims.append((layer_size, layer_size))
        dims.append((layer_size, output_dim))

        self.params = []        # original PyTorch-layout params (for the reference)
        self.kernel_w = []      # kernel-layout weights (built once)
        self.fout_pads = []
        b_rest_parts = []
        prev_fout_pad = None
        for li, (fin, fout) in enumerate(dims):
            key, kw, kb = jax.random.split(key, 3)
            D = fout * (fin + 1)
            # PyTorch kaiming_uniform_(a=sqrt(5)) on (H, D, C): fan_in = D * C.
            fan_in = D * cond_dim
            bound = 1.0 / math.sqrt(fan_in)
            cw = jax.random.uniform(kw, (n_heads, D, cond_dim),
                                    minval=-bound, maxval=bound, dtype=jnp.float32)
            cb = jax.random.uniform(kb, (n_heads, D),
                                    minval=-bound, maxval=bound, dtype=jnp.float32)
            self.params.append((cw, cb))

            fout_pad = _round_up(fout, 8)
            if li == 0:
                fin_cols = cond_dim + 1 + fin       # [cond | 1 | x(+add)] columns
                x_off, fold = cond_dim + 1, True
            else:
                fin_cols = prev_fout_pad
                x_off, fold = 0, False
            W, B = _layer_to_kernel_layout(cw, cb, fin, fout, cond_dim,
                                           fin_cols, fout_pad, x_off, fold)
            self.kernel_w.append(W)
            if li > 0:
                b_rest_parts.append(B)
            self.fout_pads.append(fout_pad)
            prev_fout_pad = fout_pad
        # Stacked x-bias columns of all layers >= 1: (H, sum fp_{l>=1}, C+1).
        self.kernel_b_rest = jnp.concatenate(b_rest_parts, axis=1)

    # --- affine helpers (scalars baked into the fused kernel / wrapper pass) ----
    def _pre_affine(self):
        if self.data_input_range_min is None or self.data_input_range_max is None:
            return 1.0, 0.0
        x_center = (self.data_input_range_max + self.data_input_range_min) / 2
        x_scale = (self.data_input_range_max - self.data_input_range_min) / 2
        in_center = (self.mlp_input_range_max + self.mlp_input_range_min) / 2
        in_scale = (self.mlp_input_range_max - self.mlp_input_range_min) / 2
        scale = in_scale / x_scale
        shift = in_center - x_center * scale
        return float(scale), float(shift)

    def _post_affine(self):
        if self.output_range_min is None or self.output_range_max is None:
            return 1.0, 0.0
        out_center = (self.output_range_max + self.output_range_min) / 2
        out_scale = (self.output_range_max - self.output_range_min) / 2
        return float(out_scale), float(out_center)

    # --- fused Pallas forward ---------------------------------------------------
    def forward(self, x, cond, additional_input=None, tile_n=2048,
                use_bf16_mxu=False):
        if additional_input is None and self.additional_input_dim > 0:
            raise ValueError('Additional input is required.')
        pre_scale, pre_shift = self._pre_affine()
        post_scale, post_shift = self._post_affine()
        return fused_meta_mlp_pallas(
            x, cond, additional_input,
            self.kernel_w, self.kernel_b_rest, self.fout_pads,
            out_dim=self.output_dim,
            pre_scale=pre_scale, pre_shift=pre_shift,
            post_scale=post_scale, post_shift=post_shift,
            tile_n=tile_n,
            mxu_dtype=jnp.bfloat16 if use_bf16_mxu else jnp.float32)

    # --- pure-JAX reference (mirrors the PyTorch module) -------------------------
    def forward_ref(self, x, cond, additional_input=None):
        if self.data_input_range_min is not None and self.data_input_range_max is not None:
            x_center = (self.data_input_range_max + self.data_input_range_min) / 2
            x_scale = (self.data_input_range_max - self.data_input_range_min) / 2
            res = (x - x_center) / x_scale
            in_center = (self.mlp_input_range_max + self.mlp_input_range_min) / 2
            in_scale = (self.mlp_input_range_max - self.mlp_input_range_min) / 2
            res = res * in_scale + in_center
        else:
            res = x
        if additional_input is not None:
            res = jnp.concatenate([res, additional_input], axis=-1)
        n_layers = len(self.params)
        for li, (cw, cb) in enumerate(self.params):
            res = meta_multi_linear_ref(res, cond, cw, cb)
            if li < n_layers - 1:
                res = jnp.maximum(res, 0.0)
        if self.output_range_min is not None and self.output_range_max is not None:
            out_center = (self.output_range_max + self.output_range_min) / 2
            out_scale = (self.output_range_max - self.output_range_min) / 2
            res = res * out_scale + out_center
        return res


# ----------------------------------------------------------------------------
if __name__ == "__main__":
    key = jax.random.PRNGKey(0)

    # ---- main config: 3 layers, fused pre/post affines, non-aligned N ----------
    n_heads, n_layer, layer_size = 2, 3, 32
    input_dim, cond_dim, output_dim = 3, 8, 3
    n_points = 333                       # not 128-aligned -> exercises tail handling

    key, k_model, k_x, k_c = jax.random.split(key, 4)
    model = DeformationMetaMultiMLP(
        k_model, n_heads, n_layer, layer_size, input_dim, cond_dim, output_dim,
        data_input_range_min=-2.0, data_input_range_max=2.0,
        output_range_min=0.0, output_range_max=2.0)

    x = jax.random.uniform(k_x, (n_heads, n_points, input_dim),
                           minval=-2.0, maxval=2.0, dtype=jnp.float32)
    cond = jax.random.normal(k_c, (n_heads, n_points, cond_dim), dtype=jnp.float32)

    out = jax.block_until_ready(model.forward(x, cond))
    ref = jax.block_until_ready(model.forward_ref(x, cond))
    assert out.shape == (n_heads, n_points, output_dim), out.shape
    err = float(jnp.max(jnp.abs(out - ref)))
    assert jnp.allclose(out, ref, rtol=1e-4, atol=1e-4), err

    # ---- optional bf16-MXU path (relaxed tolerance) -----------------------------
    out_bf16 = jax.block_until_ready(model.forward(x, cond, use_bf16_mxu=True))
    err_bf16 = float(jnp.max(jnp.abs(out_bf16 - ref)))
    assert jnp.allclose(out_bf16, ref, rtol=5e-2, atol=5e-2), err_bf16

    # ---- secondary config: 2 layers, additional input, different dims ----------
    key, k_m2, k_x2, k_c2, k_a2 = jax.random.split(key, 5)
    model2 = DeformationMetaMultiMLP(
        k_m2, n_heads=1, n_layer=2, layer_size=16, input_dim=3, cond_dim=4,
        output_dim=2, additional_input_dim=2,
        data_input_range_min=-3.0, data_input_range_max=3.0)
    x2 = jax.random.uniform(k_x2, (1, 257, 3), minval=-3.0, maxval=3.0,
                            dtype=jnp.float32)
    cond2 = jax.random.normal(k_c2, (1, 257, 4), dtype=jnp.float32)
    add2 = jax.random.normal(k_a2, (1, 257, 2), dtype=jnp.float32)

    out2 = jax.block_until_ready(model2.forward(x2, cond2, additional_input=add2))
    ref2 = jax.block_until_ready(model2.forward_ref(x2, cond2, additional_input=add2))
    assert out2.shape == (1, 257, 2), out2.shape
    err2 = float(jnp.max(jnp.abs(out2 - ref2)))
    assert jnp.allclose(out2, ref2, rtol=1e-4, atol=1e-4), err2

    print("KERNEL_OK")
</pallas_src>

<mosaic_0001>
module attributes {stable_mosaic.version = 11 : i64} {
  func.func @_fused_meta_mlp_kernel(%arg0: i32, %arg1: i32, %arg2: memref<1x12x384xf32, #tpu.memory_space<vmem>>, %arg3: memref<1x288x12xf32, #tpu.memory_space<vmem>>, %arg4: memref<1x288x32xf32, #tpu.memory_space<vmem>>, %arg5: memref<1x72x32xf32, #tpu.memory_space<vmem>>, %arg6: memref<1x40x9xf32, #tpu.memory_space<vmem>>, %arg7: memref<1x8x384xf32, #tpu.memory_space<vmem>>) attributes {dimension_semantics = [#tpu.dimension_semantics<parallel>, #tpu.dimension_semantics<parallel>], iteration_bounds = array<i64: 2, 1>, scalar_prefetch = 0 : i64, scratch_operands = 0 : i64, tpu.core_type = #tpu.core_type<tc>, window_params = [{transform_indices = @transform_0, window_bounds = array<i64: 1, 12, 384>}, {transform_indices = @transform_1, window_bounds = array<i64: 1, 288, 12>}, {transform_indices = @transform_2, window_bounds = array<i64: 1, 288, 32>}, {transform_indices = @transform_3, window_bounds = array<i64: 1, 72, 32>}, {transform_indices = @transform_4, window_bounds = array<i64: 1, 40, 9>}, {transform_indices = @transform_5, window_bounds = array<i64: 1, 8, 384>}]} {
    %c0 = arith.constant 0 : index
    %c0_0 = arith.constant 0 : index
    %c0_1 = arith.constant 0 : index
    %0 = vector.load %arg2[%c0, %c0_0, %c0_1] : memref<1x12x384xf32, #tpu.memory_space<vmem>>, vector<1x12x384xf32>
    %1 = vector.shape_cast %0 : vector<1x12x384xf32> to vector<12x384xf32>
    %2 = vector.extract_strided_slice %1 {offsets = [0, 0], sizes = [9, 384], strides = [1, 1]} : vector<12x384xf32> to vector<9x384xf32>
    %3 = vector.extract_strided_slice %2 {offsets = [0, 0], sizes = [1, 384], strides = [1, 1]} : vector<9x384xf32> to vector<1x384xf32>
    %4 = vector.extract_strided_slice %2 {offsets = [1, 0], sizes = [1, 384], strides = [1, 1]} : vector<9x384xf32> to vector<1x384xf32>
    %5 = vector.extract_strided_slice %2 {offsets = [2, 0], sizes = [1, 384], strides = [1, 1]} : vector<9x384xf32> to vector<1x384xf32>
    %6 = vector.extract_strided_slice %2 {offsets = [3, 0], sizes = [1, 384], strides = [1, 1]} : vector<9x384xf32> to vector<1x384xf32>
    %7 = vector.extract_strided_slice %2 {offsets = [4, 0], sizes = [1, 384], strides = [1, 1]} : vector<9x384xf32> to vector<1x384xf32>
    %8 = vector.extract_strided_slice %2 {offsets = [5, 0], sizes = [1, 384], strides = [1, 1]} : vector<9x384xf32> to vector<1x384xf32>
    %9 = vector.extract_strided_slice %2 {offsets = [6, 0], sizes = [1, 384], strides = [1, 1]} : vector<9x384xf32> to vector<1x384xf32>
    %10 = vector.extract_strided_slice %2 {offsets = [7, 0], sizes = [1, 384], strides = [1, 1]} : vector<9x384xf32> to vector<1x384xf32>
    %c0_2 = arith.constant 0 : index
    %c0_3 = arith.constant 0 : index
    %c0_4 = arith.constant 0 : index
    %11 = vector.load %arg6[%c0_2, %c0_3, %c0_4] : memref<1x40x9xf32, #tpu.memory_space<vmem>>, vector<1x40x9xf32>
    %12 = vector.shape_cast %11 : vector<1x40x9xf32> to vector<40x9xf32>
    %cst = arith.constant dense<0.000000e+00> : vector<40x384xf32>
    %13 = tpu.matmul %12, %2, %cst {dimension_numbers = #tpu.dot_dimension_numbers<[1], [0], [0], [1], [0, 0, 1, 1], [], []>} : vector<40x9xf32>, vector<9x384xf32>, vector<40x384xf32> -> vector<40x384xf32>
    %c0_5 = arith.constant 0 : index
    %c0_6 = arith.constant 0 : index
    %c0_7 = arith.constant 0 : index
    %14 = vector.load %arg3[%c0_5, %c0_6, %c0_7] : memref<1x288x12xf32, #tpu.memory_space<vmem>>, vector<1x288x12xf32>
    %15 = vector.shape_cast %14 : vector<1x288x12xf32> to vector<288x12xf32>
    %cst_8 = arith.constant dense<0.000000e+00> : vector<288x384xf32>
    %16 = tpu.matmul %15, %1, %cst_8 {dimension_numbers = #tpu.dot_dimension_numbers<[1], [0], [0], [1], [0, 0, 1, 1], [], []>} : vector<288x12xf32>, vector<12x384xf32>, vector<288x384xf32> -> vector<288x384xf32>
    %17 = vector.extract_strided_slice %16 {offsets = [256, 0], sizes = [32, 384], strides = [1, 1]} : vector<288x384xf32> to vector<32x384xf32>
    %18 = vector.extract_strided_slice %16 {offsets = [0, 0], sizes = [32, 384], strides = [1, 1]} : vector<288x384xf32> to vector<32x384xf32>
    %19 = vector.broadcast %3 : vector<1x384xf32> to vector<32x384xf32>
    %20 = arith.mulf %19, %18 : vector<32x384xf32>
    %21 = arith.addf %17, %20 : vector<32x384xf32>
    %22 = vector.extract_strided_slice %16 {offsets = [32, 0], sizes = [32, 384], strides = [1, 1]} : vector<288x384xf32> to vector<32x384xf32>
    %23 = vector.broadcast %4 : vector<1x384xf32> to vector<32x384xf32>
    %24 = arith.mulf %23, %22 : vector<32x384xf32>
    %25 = vector.extract_strided_slice %16 {offsets = [64, 0], sizes = [32, 384], strides = [1, 1]} : vector<288x384xf32> to vector<32x384xf32>
    %26 = vector.broadcast %5 : vector<1x384xf32> to vector<32x384xf32>
    %27 = arith.mulf %26, %25 : vector<32x384xf32>
    %28 = arith.addf %21, %27 : vector<32x384xf32>
    %29 = vector.extract_strided_slice %16 {offsets = [96, 0], sizes = [32, 384], strides = [1, 1]} : vector<288x384xf32> to vector<32x384xf32>
    %30 = vector.broadcast %6 : vector<1x384xf32> to vector<32x384xf32>
    %31 = arith.mulf %30, %29 : vector<32x384xf32>
    %32 = arith.addf %24, %31 : vector<32x384xf32>
    %33 = vector.extract_strided_slice %16 {offsets = [128, 0], sizes = [32, 384], strides = [1, 1]} : vector<288x384xf32> to vector<32x384xf32>
    %34 = vector.broadcast %7 : vector<1x384xf32> to vector<32x384xf32>
    %35 = arith.mulf %34, %33 : vector<32x384xf32>
    %36 = arith.addf %28, %35 : vector<32x384xf32>
    %37 = vector.extract_strided_slice %16 {offsets = [160, 0], sizes = [32, 384], strides = [1, 1]} : vector<288x384xf32> to vector<32x384xf32>
    %38 = vector.broadcast %8 : vector<1x384xf32> to vector<32x384xf32>
    %39 = arith.mulf %38, %37 : vector<32x384xf32>
    %40 = arith.addf %32, %39 : vector<32x384xf32>
    %41 = vector.extract_strided_slice %16 {offsets = [192, 0], sizes = [32, 384], strides = [1, 1]} : vector<288x384xf32> to vector<32x384xf32>
    %42 = vector.broadcast %9 : vector<1x384xf32> to vector<32x384xf32>
    %43 = arith.mulf %42, %41 : vector<32x384xf32>
    %44 = arith.addf %36, %43 : vector<32x384xf32>
    %45 = vector.extract_strided_slice %16 {offsets = [224, 0], sizes = [32, 384], strides = [1, 1]} : vector<288x384xf32> to vector<32x384xf32>
    %46 = vector.broadcast %10 : vector<1x384xf32> to vector<32x384xf32>
    %47 = arith.mulf %46, %45 : vector<32x384xf32>
    %48 = arith.addf %40, %47 : vector<32x384xf32>
    %49 = arith.addf %44, %48 : vector<32x384xf32>
    %cst_9 = arith.constant 0.000000e+00 : f32
    %50 = vector.broadcast %cst_9 : f32 to vector<32x384xf32>
    %51 = arith.maximumf %49, %50 : vector<32x384xf32>
    %c0_10 = arith.constant 0 : index
    %c0_11 = arith.constant 0 : index
    %c0_12 = arith.constant 0 : index
    %52 = vector.load %arg4[%c0_10, %c0_11, %c0_12] : memref<1x288x32xf32, #tpu.memory_space<vmem>>, vector<1x288x32xf32>
    %53 = vector.shape_cast %52 : vector<1x288x32xf32> to vector<288x32xf32>
    %cst_13 = arith.constant dense<0.000000e+00> : vector<288x384xf32>
    %54 = tpu.matmul %53, %51, %cst_13 {dimension_numbers = #tpu.dot_dimension_numbers<[1], [0], [0], [1], [0, 0, 1, 1], [], []>} : vector<288x32xf32>, vector<32x384xf32>, vector<288x384xf32> -> vector<288x384xf32>
    %55 = vector.extract_strided_slice %54 {offsets = [256, 0], sizes = [32, 384], strides = [1, 1]} : vector<288x384xf32> to vector<32x384xf32>
    %56 = vector.extract_strided_slice %13 {offsets = [0, 0], sizes = [32, 384], strides = [1, 1]} : vector<40x384xf32> to vector<32x384xf32>
    %57 = arith.addf %55, %56 : vector<32x384xf32>
    %58 = vector.extract_strided_slice %54 {offsets = [0, 0], sizes = [32, 384], strides = [1, 1]} : vector<288x384xf32> to vector<32x384xf32>
    %59 = vector.broadcast %3 : vector<1x384xf32> to vector<32x384xf32>
    %60 = arith.mulf %59, %58 : vector<32x384xf32>
    %61 = arith.addf %57, %60 : vector<32x384xf32>
    %62 = vector.extract_strided_slice %54 {offsets = [32, 0], sizes = [32, 384], strides = [1, 1]} : vector<288x384xf32> to vector<32x384xf32>
    %63 = vector.broadcast %4 : vector<1x384xf32> to vector<32x384xf32>
    %64 = arith.mulf %63, %62 : vector<32x384xf32>
    %65 = vector.extract_strided_slice %54 {offsets = [64, 0], sizes = [32, 384], strides = [1, 1]} : vector<288x384xf32> to vector<32x384xf32>
    %66 = vector.broadcast %5 : vector<1x384xf32> to vector<32x384xf32>
    %67 = arith.mulf %66, %65 : vector<32x384xf32>
    %68 = arith.addf %61, %67 : vector<32x384xf32>
    %69 = vector.extract_strided_slice %54 {offsets = [96, 0], sizes = [32, 384], strides = [1, 1]} : vector<288x384xf32> to vector<32x384xf32>
    %70 = vector.broadcast %6 : vector<1x384xf32> to vector<32x384xf32>
    %71 = arith.mulf %70, %69 : vector<32x384xf32>
    %72 = arith.addf %64, %71 : vector<32x384xf32>
    %73 = vector.extract_strided_slice %54 {offsets = [128, 0], sizes = [32, 384], strides = [1, 1]} : vector<288x384xf32> to vector<32x384xf32>
    %74 = vector.broadcast %7 : vector<1x384xf32> to vector<32x384xf32>
    %75 = arith.mulf %74, %73 : vector<32x384xf32>
    %76 = arith.addf %68, %75 : vector<32x384xf32>
    %77 = vector.extract_strided_slice %54 {offsets = [160, 0], sizes = [32, 384], strides = [1, 1]} : vector<288x384xf32> to vector<32x384xf32>
    %78 = vector.broadcast %8 : vector<1x384xf32> to vector<32x384xf32>
    %79 = arith.mulf %78, %77 : vector<32x384xf32>
    %80 = arith.addf %72, %79 : vector<32x384xf32>
    %81 = vector.extract_strided_slice %54 {offsets = [192, 0], sizes = [32, 384], strides = [1, 1]} : vector<288x384xf32> to vector<32x384xf32>
    %82 = vector.broadcast %9 : vector<1x384xf32> to vector<32x384xf32>
    %83 = arith.mulf %82, %81 : vector<32x384xf32>
    %84 = arith.addf %76, %83 : vector<32x384xf32>
    %85 = vector.extract_strided_slice %54 {offsets = [224, 0], sizes = [32, 384], strides = [1, 1]} : vector<288x384xf32> to vector<32x384xf32>
    %86 = vector.broadcast %10 : vector<1x384xf32> to vector<32x384xf32>
    %87 = arith.mulf %86, %85 : vector<32x384xf32>
    %88 = arith.addf %80, %87 : vector<32x384xf32>
    %89 = arith.addf %84, %88 : vector<32x384xf32>
    %cst_14 = arith.constant 0.000000e+00 : f32
    %90 = vector.broadcast %cst_14 : f32 to vector<32x384xf32>
    %91 = arith.maximumf %89, %90 : vector<32x384xf32>
    %c0_15 = arith.constant 0 : index
    %c0_16 = arith.constant 0 : index
    %c0_17 = arith.constant 0 : index
    %92 = vector.load %arg5[%c0_15, %c0_16, %c0_17] : memref<1x72x32xf32, #tpu.memory_space<vmem>>, vector<1x72x32xf32>
    %93 = vector.shape_cast %92 : vector<1x72x32xf32> to vector<72x32xf32>
    %cst_18 = arith.constant dense<0.000000e+00> : vector<72x384xf32>
    %94 = tpu.matmul %93, %91, %cst_18 {dimension_numbers = #tpu.dot_dimension_numbers<[1], [0], [0], [1], [0, 0, 1, 1], [], []>} : vector<72x32xf32>, vector<32x384xf32>, vector<72x384xf32> -> vector<72x384xf32>
    %95 = vector.extract_strided_slice %94 {offsets = [64, 0], sizes = [8, 384], strides = [1, 1]} : vector<72x384xf32> to vector<8x384xf32>
    %96 = vector.extract_strided_slice %13 {offsets = [32, 0], sizes = [8, 384], strides = [1, 1]} : vector<40x384xf32> to vector<8x384xf32>
    %97 = arith.addf %95, %96 : vector<8x384xf32>
    %98 = vector.extract_strided_slice %94 {offsets = [0, 0], sizes = [8, 384], strides = [1, 1]} : vector<72x384xf32> to vector<8x384xf32>
    %99 = vector.broadcast %3 : vector<1x384xf32> to vector<8x384xf32>
    %100 = arith.mulf %99, %98 : vector<8x384xf32>
    %101 = arith.addf %97, %100 : vector<8x384xf32>
    %102 = vector.extract_strided_slice %94 {offsets = [8, 0], sizes = [8, 384], strides = [1, 1]} : vector<72x384xf32> to vector<8x384xf32>
    %103 = vector.broadcast %4 : vector<1x384xf32> to vector<8x384xf32>
    %104 = arith.mulf %103, %102 : vector<8x384xf32>
    %105 = vector.extract_strided_slice %94 {offsets = [16, 0], sizes = [8, 384], strides = [1, 1]} : vector<72x384xf32> to vector<8x384xf32>
    %106 = vector.broadcast %5 : vector<1x384xf32> to vector<8x384xf32>
    %107 = arith.mulf %106, %105 : vector<8x384xf32>
    %108 = arith.addf %101, %107 : vector<8x384xf32>
    %109 = vector.extract_strided_slice %94 {offsets = [24, 0], sizes = [8, 384], strides = [1, 1]} : vector<72x384xf32> to vector<8x384xf32>
    %110 = vector.broadcast %6 : vector<1x384xf32> to vector<8x384xf32>
    %111 = arith.mulf %110, %109 : vector<8x384xf32>
    %112 = arith.addf %104, %111 : vector<8x384xf32>
    %113 = vector.extract_strided_slice %94 {offsets = [32, 0], sizes = [8, 384], strides = [1, 1]} : vector<72x384xf32> to vector<8x384xf32>
    %114 = vector.broadcast %7 : vector<1x384xf32> to vector<8x384xf32>
    %115 = arith.mulf %114, %113 : vector<8x384xf32>
    %116 = arith.addf %108, %115 : vector<8x384xf32>
    %117 = vector.extract_strided_slice %94 {offsets = [40, 0], sizes = [8, 384], strides = [1, 1]} : vector<72x384xf32> to vector<8x384xf32>
    %118 = vector.broadcast %8 : vector<1x384xf32> to vector<8x384xf32>
    %119 = arith.mulf %118, %117 : vector<8x384xf32>
    %120 = arith.addf %112, %119 : vector<8x384xf32>
    %121 = vector.extract_strided_slice %94 {offsets = [48, 0], sizes = [8, 384], strides = [1, 1]} : vector<72x384xf32> to vector<8x384xf32>
    %122 = vector.broadcast %9 : vector<1x384xf32> to vector<8x384xf32>
    %123 = arith.mulf %122, %121 : vector<8x384xf32>
    %124 = arith.addf %116, %123 : vector<8x384xf32>
    %125 = vector.extract_strided_slice %94 {offsets = [56, 0], sizes = [8, 384], strides = [1, 1]} : vector<72x384xf32> to vector<8x384xf32>
    %126 = vector.broadcast %10 : vector<1x384xf32> to vector<8x384xf32>
    %127 = arith.mulf %126, %125 : vector<8x384xf32>
    %128 = arith.addf %120, %127 : vector<8x384xf32>
    %129 = arith.addf %124, %128 : vector<8x384xf32>
    %cst_19 = arith.constant 1.000000e+00 : f32
    %130 = vector.broadcast %cst_19 : f32 to vector<8x384xf32>
    %131 = arith.mulf %129, %130 : vector<8x384xf32>
    %cst_20 = arith.constant 1.000000e+00 : f32
    %132 = vector.broadcast %cst_20 : f32 to vector<8x384xf32>
    %133 = arith.addf %131, %132 : vector<8x384xf32>
    %c0_21 = arith.constant 0 : index
    %c0_22 = arith.constant 0 : index
    %c0_23 = arith.constant 0 : index
    %134 = vector.load %arg7[%c0_21, %c0_22, %c0_23] : memref<1x8x384xf32, #tpu.memory_space<vmem>>, vector<1x8x384xf32>
    %135 = vector.shape_cast %134 : vector<1x8x384xf32> to vector<8x384xf32>
    %136 = vector.shape_cast %133 : vector<8x384xf32> to vector<1x8x384xf32>
    tpu.vector_store %arg7[%c0_21, %c0_22, %c0_23], %136 {strides = array<i32>} : memref<1x8x384xf32, #tpu.memory_space<vmem>>, vector<1x8x384xf32>,
    return
  }
  func.func @transform_0(%arg0: i32, %arg1: i32) -> (i32, i32, i32) {
    %c0_i32 = arith.constant 0 : i32
    %c0_i32_0 = arith.constant 0 : i32
    return %arg0, %c0_i32, %arg1 : i32, i32, i32
  }
  func.func @transform_1(%arg0: i32, %arg1: i32) -> (i32, i32, i32) {
    %c0_i32 = arith.constant 0 : i32
    %c0_i32_0 = arith.constant 0 : i32
    %c0_i32_1 = arith.constant 0 : i32
    return %arg0, %c0_i32, %c0_i32_0 : i32, i32, i32
  }
  func.func @transform_2(%arg0: i32, %arg1: i32) -> (i32, i32, i32) {
    %c0_i32 = arith.constant 0 : i32
    %c0_i32_0 = arith.constant 0 : i32
    %c0_i32_1 = arith.constant 0 : i32
    return %arg0, %c0_i32, %c0_i32_0 : i32, i32, i32
  }
  func.func @transform_3(%arg0: i32, %arg1: i32) -> (i32, i32, i32) {
    %c0_i32 = arith.constant 0 : i32
    %c0_i32_0 = arith.constant 0 : i32
    %c0_i32_1 = arith.constant 0 : i32
    return %arg0, %c0_i32, %c0_i32_0 : i32, i32, i32
  }
  func.func @transform_4(%arg0: i32, %arg1: i32) -> (i32, i32, i32) {
    %c0_i32 = arith.constant 0 : i32
    %c0_i32_0 = arith.constant 0 : i32
    %c0_i32_1 = arith.constant 0 : i32
    return %arg0, %c0_i32, %c0_i32_0 : i32, i32, i32
  }
  func.func @transform_5(%arg0: i32, %arg1: i32) -> (i32, i32, i32) {
    %c0_i32 = arith.constant 0 : i32
    %c0_i32_0 = arith.constant 0 : i32
    return %arg0, %c0_i32, %arg1 : i32, i32, i32
  }
}

</mosaic_0001>

<bundles_post_ra>
// kernel: tpu_custom_call.1
= control target key start
LH: loop header
LB: loop body
LE: loop exit
PB: predicated region body
PF: predicated region fallthrough
CT: control target
= control target key end

     0   :  { %10 = vsyncpa [#allocation3], 0  ;;  %s5237_s0 = inlined_call_operand.vmem [shape: f32[2,12,384], index: 0, kind: input, shape index: {}]   ;;  %s5238_s1 = inlined_call_operand.vmem [shape: f32[2,288,12], index: 1, kind: input, shape index: {}]   ;;  %s5239_s2 = inlined_call_operand.vmem [shape: f32[2,288,32], index: 2, kind: input, shape index: {}]   ;;  %s5240_s3 = inlined_call_operand.vmem [shape: f32[2,72,32], index: 3, kind: input, shape index: {}]   ;;  %s5241_s4 = inlined_call_operand.vmem [shape: f32[2,40,9], index: 4, kind: input, shape index: {}]   ;;  %s5242_s5 = inlined_call_operand.hbm [shape: f32[2,8,384], index: 5, kind: output, shape index: {}]  }
   0x1   :  { %12 = vsyncpa [#allocation3 + $0x1], 0  ;;  %s3592_s18 = smov 0   ;;  %s3594_s19 = smov 0  }
   0x2   :  { %s3596_s20 = smov 0   ;;  %s3598_s21 = smov 0  }
   0x3   :  { %s3600_s22 = smov 0   ;;  %s3602_s23 = smov 0  }
   0x4 LB: > { %s2884_s24 = sadd.s32 4294967295, %s3555_s23   ;;  %s2885_s25 = sadd.s32 4294967294, %s3555_s23   ;;  %s3555_s23 = sphi %s3602_s23, %s18_s23   ;;  %s3551_s22 = sphi %s3600_s22, %s5475_s22   ;;  %s3547_s21 = sphi %s3598_s21, %s5474_s21   ;;  %s3543_s20 = sphi %s3596_s20, %s5473_s20   ;;  %s3539_s19 = sphi %s3594_s19, %s5472_s19   ;;  %s3535_s18 = sphi %s3592_s18, %s5471_s18  }
   0x5   : > { %s30_s26 = sadd.s32 1, %s3551_s22  ;;  %s171_s27 = sadd.s32 1, %s3543_s20 }
   0x6   : > { %p32_p0 = scmp.ge.s32.totalorder %s30_s26, 2  ;;  %p181_p1 = scmp.ne.s32.totalorder %s3543_s20, %s3539_s19 }
   0x7   : > { %p182_p2 = scmp.eq.s32.totalorder %s2884_s24, 1  ;;  %p187_p3 = scmp.ne.s32.totalorder %s3539_s19, %s3535_s18 }
   0x8   : > { %s5477_s26 = smov (%p32_p0, %s30_s26), 0  ;;  %p188_p5 = scmp.eq.s32.totalorder %s2885_s25, 1 }
   0x9   : > { %p3632_p4 = por %p182_p2, %p181_p1  ;;  %s166_s29 = ssub.s32 %s3551_s22, %s5477_s26 }
   0xa   : > { %p2888_p6 = scmp.ge.s32.totalorder %s3555_s23, 1  ;;  %p169_p7 = scmp.eq.s32.totalorder %s166_s29, 0 }
   0xb   : > { %p3639_p8 = por %p188_p5, %p187_p3  ;;  %p251_p9 = scmp.lt.s32.totalorder %s3555_s23, 3 }
   0xc   : > { %s3645_s6 = scalar_select %p169_p7, %s3543_s20, %s171_s27  }
   0xd   : > { %p252_p10 = pnand %p2888_p6, %p251_p9 }
   0xf   : > { %255 = sbr.rel (%p252_p10) target bundleno = 1002 (0x3ea), region = 40 }
  0x16   : > { %p304_p11 = scmp.lt.s32.totalorder %s3547_s21, 1  ;;  %v5243_v0 = vmov 0.0|0.0   ;;  %vm3558_vm0 = vmmov 0   ;;  %v5245_v1 = vmov 0.0   ;;  %vm361_vm1 = vcmask 1040384   ;;  %s3416_s14 = smul.u32 384, %s3547_s21 }
  0x17   : > { %3353 = vmatprep.subr.bf16.mxu1 %v5243_v0  ;;  %3177 = vmatprep.mubr.msk.f32.mxu1 %vm3558_vm0, %v5245_v1  ;;  %vm3560_vm2 = vmmov 1   ;;  %vm701_vm4 = vcmask 1043456   ;;  %vm345_vm6 = vcmask 72704   ;;  %vm592_vm7 = vcmask 97280   ;;  %s3561_s29 = smov [#allocation2]  }
  0x18   : > { %s3650_s7 = scalar_select %p304_p11, %s3547_s21, 1  ;;  %435 = vmatprep.mubr.f32.mxu0 %v5245_v1  ;;  %vm3661_vm3 = vmpackc.low %vm361_vm1, %vm3560_vm2  ;;  %vm1570_vm8 = vcmask 261120  }
  0x19   : > { %vm3684_vm5 = vmpackc.low %vm701_vm4, %vm3560_vm2 }
  0x1a   : > { %s3412_s8 = smul.u32 48, %s3650_s7 }
  0x1b   : > { %s3415_s12 = smul.u32 40, %s3650_s7 }
  0x1c   : > { %s3659_s11 = scalar_lea.vmem %s5237_s0, %s3412_s8  ;;  %s3413_s16 = smul.u32 288, %s3650_s7 }
  0x1d   : > { %v3667_v3 = vld [vmem:[%s3659_s11] sm:$0xff]  ;;  %v3670_v4 = vld [vmem:[%s3659_s11 + $0x8] sm:$0xff]  ;;  %v3673_v5 = vld [vmem:[%s3659_s11 + $0x10] sm:$0xff]  ;;  %s3681_s15 = scalar_lea.vmem %s5241_s4, %s3415_s12  ;;  %s3414_s9 = smul.u32 72, %s3650_s7 }
  0x1e   : > { %5309 = vst [vmem:[#allocation5_spill] sm:$0xff] %v3673_v5  ;;  %v338_v6 = vld [vmem:[%s3659_s11 + $0x20] sm:$0xf]  ;;  %v339_v7 = vld [vmem:[%s3659_s11 + $0x28] sm:$0xf]  ;;  %v342_v15 = vld [vmem:[%s3681_s15 + $0x10] sm:$0xff]  ;;  %s3736_s25 = scalar_lea.vmem %s5238_s1, %s3413_s16  ;;  %s3981_s8 = scalar_lea.vmem %s5239_s2, %s3413_s16 }
  0x1f   : > { %v337_v8 = vld [vmem:[%s3659_s11 + $0x18] sm:$0xf]  ;;  %v3347_v9 = vpack.c.bf16 %v338_v6, %v3670_v4  ;;  %v3354_v11 = vpack.c.bf16 %v339_v7, %v3673_v5  ;;  %v340_v13 = vld [vmem:[%s3681_s15] sm:$0xff]  ;;  %v341_v14 = vld [vmem:[%s3681_s15 + $0x8] sm:$0xff]  ;;  %s5103_s12 = scalar_lea.vmem %s5240_s3, %s3414_s9  ;;  %s300_s7 = sand.u32 1, %s3539_s19  }
  0x20   : > { %v3350_v12 = vpack.c.bf16 %v337_v8, %v3667_v3  ;;  %v343_v16 = vld [vmem:[%s3681_s15 + $0x18] sm:$0xff]  ;;  %v344_v17 = vld [vmem:[%s3681_s15 + $0x20] sm:$0xff]  ;;  %v3743_v18 = vld [vmem:[%s3736_s25 + $0x90] sm:$0xff]  ;;  %s3411_s13 = smul.u32 24, %s300_s7  ;;  %s2744_s21 = scalar_lea.sflag [#allocation3], %s300_s7 }
  0x21   : > { %3349 = vmatprep.subr.msk.bf16.mxu0 %vm3661_vm3, %v3347_v9  ;;  %3356 = vmatpush3.bf16.msk.msra.mxu1 %vm3661_vm3, %v3354_v11  ;;  %v3747_v19 = vld [vmem:[%s3736_s25] sm:$0xff]  ;;  %v3755_v20 = vld [vmem:[%s3736_s25 + $0x98] sm:$0xff]  ;;  %v3759_v21 = vld [vmem:[%s3736_s25 + $0x8] sm:$0xff] }
  0x22   : > { %3352 = vmatpush1.bf16.msk.msra.mxu0 %vm3661_vm3, %v3350_v12  ;;  %3399 = vmatprep.subr.msk.bf16.mxu1 %vm3684_vm5, %v3347_v9  ;;  %v3769_v22 = vld [vmem:[%s3736_s25 + $0xa0] sm:$0xff]  ;;  %v3773_v23 = vld [vmem:[%s3736_s25 + $0x10] sm:$0xff]  ;;  %v3781_v24 = vld [vmem:[%s3736_s25 + $0xa8] sm:$0xff]  ;;  %s302_s15 = scalar_lea.vmem [#allocation2], %s3411_s13 }
  0x23   : > { %3359 = vmatprep.subr.msk.bf16.mxu0 %vm3684_vm5, %v3347_v9  ;;  %v3785_v25 = vld [vmem:[%s3736_s25 + $0x18] sm:$0xff]  ;;  %v3793_v26 = vld [vmem:[%s3736_s25 + $0xb0] sm:$0xff]  ;;  %v3797_v27 = vld [vmem:[%s3736_s25 + $0x20] sm:$0xff]  ;;  %s2760_s16 = sshll.u32 %s302_s15, 4  ;;  %s5190_s16 = int_to_ptr.vmem [resolvable:$true] %s2760_s16 }
  0x24   : > { %3178 = vmatmul.mubr.msk.f32.vlgmr.msra.gmra.mrb[0].mxu1 %vm345_vm6, %v340_v13  ;;  %v3805_v28 = vld [vmem:[%s3736_s25 + $0xb8] sm:$0xff]  ;;  %v3809_v29 = vld [vmem:[%s3736_s25 + $0x28] sm:$0xff]  ;;  %v3817_v30 = vld [vmem:[%s3736_s25 + $0xc0] sm:$0xff]  ;;  %s3477_s27 = scalar_lea.vmem %s5190_s16, 384 }
  0x25   : > { %2896 = vmatmul.mubr.msk.f32.vlgmr.msra.gmra.mrb[0].mxu0 %vm345_vm6, %v340_v13  ;;  %3180 = vmatprep.mubr.msk.f32.mxu1 %vm3558_vm0, %v5245_v1  ;;  %v3821_v31 = vld [vmem:[%s3736_s25 + $0x30] sm:$0xff]  ;;  %v3829_v32 = vld [vmem:[%s3736_s25 + $0xc8] sm:$0xff]  ;;  %v3833_v33 = vld [vmem:[%s3736_s25 + $0x38] sm:$0xff]  ;;  %p3478_p12 = scmp.ne.s32.totalorder %s5190_s16, %s3477_s27 }
  0x26   : > { %441 = vmatprep.mubr.f32.mxu0 %v5245_v1  ;;  %3400 = vmatpush1.bf16.msk.msra.mxu1 %vm3684_vm5, %v3350_v12  ;;  %v3841_v34 = vld [vmem:[%s3736_s25 + $0xd0] sm:$0xff]  ;;  %v3845_v35 = vld [vmem:[%s3736_s25 + $0x40] sm:$0xff]  ;;  %v3853_v36 = vld [vmem:[%s3736_s25 + $0xd8] sm:$0xff] }
  0x27   : > { %3362 = vmatpush1.bf16.msk.msra.mxu0 %vm3684_vm5, %v3350_v12  ;;  %3365 = vmatprep.subr.msk.bf16.mxu1 %vm3684_vm5, %v3354_v11  ;;  %v565_v37 = vld [vmem:[%s3736_s25 + $0x48] sm:$0xff]  ;;  %v3862_v38 = vld [vmem:[%s3736_s25 + $0xe0] sm:$0xff]  ;;  %v566_v39 = vld [vmem:[%s3736_s25 + $0x50] sm:$0xff]  ;;  %p3479_p13 = pnand %p3478_p12, %p3632_p4 }
  0x28   : > { %3181 = vmatmul.mubr.msk.f32.gmra.mrb[2].mxu1 %vm345_vm6, %v341_v14  ;;  %v3871_v40 = vld [vmem:[%s3736_s25 + $0xe8] sm:$0xff]  ;;  %v567_v41 = vld [vmem:[%s3736_s25 + $0x58] sm:$0xff]  ;;  %v3880_v42 = vld [vmem:[%s3736_s25 + $0xf0] sm:$0xff] }
  0x29   : > { %2897 = vmatmul.mubr.msk.f32.gmra.mrb[2].mxu0 %vm345_vm6, %v341_v14  ;;  %3183 = vmatprep.mubr.msk.f32.mxu1 %vm3558_vm0, %v5245_v1  ;;  %v568_v43 = vld [vmem:[%s3736_s25 + $0x60] sm:$0xff]  ;;  %v587_v44 = vld [vmem:[%s3736_s25 + $0xf8] sm:$0xff]  ;;  %v569_v45 = vld [vmem:[%s3736_s25 + $0x68] sm:$0xff]  ;;  %p3480_p0 = pneg %p3479_p13 }
  0x2a   : > { %447 = vmatprep.mubr.f32.mxu0 %v5245_v1  ;;  %v588_v46 = vld [vmem:[%s3736_s25 + $0x100] sm:$0xff]  ;;  %v570_v47 = vld [vmem:[%s3736_s25 + $0x70] sm:$0xff]  ;;  %v589_v48 = vld [vmem:[%s3736_s25 + $0x108] sm:$0xff] }
  0x2b   : > { %v571_v49 = vld [vmem:[%s3736_s25 + $0x78] sm:$0xff]  ;;  %v590_v50 = vld [vmem:[%s3736_s25 + $0x110] sm:$0xff]  ;;  %v572_v51 = vld [vmem:[%s3736_s25 + $0x80] sm:$0xff] }
  0x2c   : > { %3184 = vmatmul.mubr.msk.f32.gmra.mrb[4].mxu1 %vm345_vm6, %v342_v15  ;;  %v591_v52 = vld [vmem:[%s3736_s25 + $0x118] sm:$0xff]  ;;  %v573_v53 = vld [vmem:[%s3736_s25 + $0x88] sm:$0xff]  ;;  %v3984_v54 = vld [vmem:[%s3981_s8] sm:$0xff]  ;;  %s5188_s25 = scalar_lea.hbm %s5242_s5, %s3416_s14 }
  0x2d   : > { %2898 = vmatmul.mubr.msk.f32.gmra.mrb[4].mxu0 %vm345_vm6, %v342_v15  ;;  %3186 = vmatprep.mubr.msk.f32.mxu1 %vm3558_vm0, %v5245_v1  ;;  %5312 = vst [vmem:[#allocation6_spill] sm:$0xff] %v3984_v54 }
  0x2e   : > { %453 = vmatprep.mubr.f32.mxu0 %v5245_v1 }
  0x30   : > { %3187 = vmatmul.mubr.msk.f32.gmra.mrb[6].mxu1 %vm345_vm6, %v343_v16 }
  0x31   : > { %2899 = vmatmul.mubr.msk.f32.gmra.mrb[6].mxu0 %vm345_vm6, %v343_v16  ;;  %3189 = vmatprep.mubr.msk.f32.mxu1 %vm3558_vm0, %v5245_v1 }
  0x32   : > { %459 = vmatprep.mubr.f32.mxu0 %v5245_v1 }
  0x34   : > { %3190 = vmatmul.mubr.msk.f32.gmra.mrb[8].mxu1 %vm345_vm6, %v344_v17 }
  0x35   : > { %2900 = vmatmul.mubr.msk.f32.gmra.mrb[8].mxu0 %vm345_vm6, %v344_v17  ;;  %880 = vmatprep.mubr.f32.mxu1 %v5245_v1 }
  0x36   : > { %772 = vmatprep.mubr.f32.mxu0 %v5245_v1 }
  0x38   : > { %2927 = vmatmul.mubr.msk.f32.vlgmr.msra.gmra.mrb[10].mxu1 %vm592_vm7, %v3743_v18 }
  0x39   : > { %2909 = vmatmul.mubr.msk.f32.vlgmr.msra.gmra.mrb[10].mxu0 %vm592_vm7, %v3747_v19  ;;  %886 = vmatprep.mubr.f32.mxu1 %v5245_v1 }
  0x3a   : > { %778 = vmatprep.mubr.f32.mxu0 %v5245_v1  ;;  %3368 = vmatpush3.bf16.msk.msra.mxu1 %vm3684_vm5, %v3354_v11 }
  0x3c   : > { %2928 = vmatmul.mubr.msk.f32.gmra.mrb[12].mxu1 %vm592_vm7, %v3755_v20 }
  0x3d   : > { %2910 = vmatmul.mubr.msk.f32.gmra.mrb[12].mxu0 %vm592_vm7, %v3759_v21  ;;  %892 = vmatprep.mubr.f32.mxu1 %v5245_v1 }
  0x3e   : > { %784 = vmatprep.mubr.f32.mxu0 %v5245_v1 }
  0x40   : > { %2929 = vmatmul.mubr.msk.f32.gmra.mrb[14].mxu1 %vm592_vm7, %v3769_v22 }
  0x41   : > { %2911 = vmatmul.mubr.msk.f32.gmra.mrb[14].mxu0 %vm592_vm7, %v3773_v23  ;;  %898 = vmatprep.mubr.f32.mxu1 %v5245_v1 }
  0x42   : > { %790 = vmatprep.mubr.f32.mxu0 %v5245_v1 }
  0x44   : > { %2930 = vmatmul.mubr.msk.f32.gmra.mrb[16].mxu1 %vm592_vm7, %v3781_v24 }
  0x45   : > { %2912 = vmatmul.mubr.msk.f32.gmra.mrb[16].mxu0 %vm592_vm7, %v3785_v25  ;;  %904 = vmatprep.mubr.f32.mxu1 %v5245_v1 }
  0x46   : > { %796 = vmatprep.mubr.f32.mxu0 %v5245_v1 }
  0x48   : > { %2931 = vmatmul.mubr.msk.f32.gmra.mrb[18].mxu1 %vm592_vm7, %v3793_v26 }
  0x49   : > { %2913 = vmatmul.mubr.msk.f32.gmra.mrb[18].mxu0 %vm592_vm7, %v3797_v27  ;;  %910 = vmatprep.mubr.f32.mxu1 %v5245_v1 }
  0x4a   : > { %802 = vmatprep.mubr.f32.mxu0 %v5245_v1 }
  0x4c   : > { %2932 = vmatmul.mubr.msk.f32.gmra.mrb[20].mxu1 %vm592_vm7, %v3805_v28 }
  0x4d   : > { %2914 = vmatmul.mubr.msk.f32.gmra.mrb[20].mxu0 %vm592_vm7, %v3809_v29  ;;  %916 = vmatprep.mubr.f32.mxu1 %v5245_v1 }
  0x4e   : > { %808 = vmatprep.mubr.f32.mxu0 %v5245_v1 }
  0x50   : > { %2933 = vmatmul.mubr.msk.f32.gmra.mrb[22].mxu1 %vm592_vm7, %v3817_v30 }
  0x51   : > { %2915 = vmatmul.mubr.msk.f32.gmra.mrb[22].mxu0 %vm592_vm7, %v3821_v31  ;;  %922 = vmatprep.mubr.f32.mxu1 %v5245_v1 }
  0x52   : > { %814 = vmatprep.mubr.f32.mxu0 %v5245_v1 }
  0x54   : > { %2934 = vmatmul.mubr.msk.f32.gmra.mrb[24].mxu1 %vm592_vm7, %v3829_v32 }
  0x55   : > { %2916 = vmatmul.mubr.msk.f32.gmra.mrb[24].mxu0 %vm592_vm7, %v3833_v33  ;;  %928 = vmatprep.mubr.f32.mxu1 %v5245_v1 }
  0x56   : > { %820 = vmatprep.mubr.f32.mxu0 %v5245_v1 }
  0x58   : > { %2935 = vmatmul.mubr.msk.f32.gmra.mrb[26].mxu1 %vm592_vm7, %v3841_v34 }
  0x59   : > { %2917 = vmatmul.mubr.msk.f32.gmra.mrb[26].mxu0 %vm592_vm7, %v3845_v35  ;;  %934 = vmatprep.mubr.f32.mxu1 %v5245_v1 }
  0x5a   : > { %826 = vmatprep.mubr.f32.mxu0 %v5245_v1 }
  0x5c   : > { %2936 = vmatmul.mubr.msk.f32.gmra.mrb[28].mxu1 %vm592_vm7, %v3853_v36 }
  0x5d   : > { %2918 = vmatmul.mubr.msk.f32.gmra.mrb[28].mxu0 %vm592_vm7, %v565_v37  ;;  %940 = vmatprep.mubr.f32.mxu1 %v5245_v1 }
  0x5e   : > { %832 = vmatprep.mubr.f32.mxu0 %v5245_v1 }
  0x60   : > { %2937 = vmatmul.mubr.msk.f32.gmra.mrb[30].mxu1 %vm592_vm7, %v3862_v38 }
  0x61   : > { %2919 = vmatmul.mubr.msk.f32.gmra.mrb[30].mxu0 %vm592_vm7, %v566_v39  ;;  %946 = vmatprep.mubr.f32.mxu1 %v5245_v1 }
  0x62   : > { %838 = vmatprep.mubr.f32.mxu0 %v5245_v1 }
  0x64   : > { %2938 = vmatmul.mubr.msk.f32.gmra.mrb[32].mxu1 %vm592_vm7, %v3871_v40 }
  0x65   : > { %2920 = vmatmul.mubr.msk.f32.gmra.mrb[32].mxu0 %vm592_vm7, %v567_v41  ;;  %952 = vmatprep.mubr.f32.mxu1 %v5245_v1 }
  0x66   : > { %844 = vmatprep.mubr.f32.mxu0 %v5245_v1 }
  0x68   : > { %2939 = vmatmul.mubr.msk.f32.gmra.mrb[34].mxu1 %vm592_vm7, %v3880_v42 }
  0x69   : > { %2921 = vmatmul.mubr.msk.f32.gmra.mrb[34].mxu0 %vm592_vm7, %v568_v43  ;;  %958 = vmatprep.mubr.f32.mxu1 %v5245_v1 }
  0x6a   : > { %850 = vmatprep.mubr.f32.mxu0 %v5245_v1 }
  0x6c   : > { %2940 = vmatmul.mubr.msk.f32.gmra.mrb[36].mxu1 %vm592_vm7, %v587_v44 }
  0x6d   : > { %2922 = vmatmul.mubr.msk.f32.gmra.mrb[36].mxu0 %vm592_vm7, %v569_v45  ;;  %964 = vmatprep.mubr.f32.mxu1 %v5245_v1 }
  0x6e   : > { %856 = vmatprep.mubr.f32.mxu0 %v5245_v1 }
  0x70   : > { %2941 = vmatmul.mubr.msk.f32.gmra.mrb[38].mxu1 %vm592_vm7, %v588_v46 }
  0x71   : > { %2923 = vmatmul.mubr.msk.f32.gmra.mrb[38].mxu0 %vm592_vm7, %v570_v47  ;;  %970 = vmatprep.mubr.f32.mxu1 %v5245_v1 }
  0x72   : > { %862 = vmatprep.mubr.f32.mxu0 %v5245_v1 }
  0x74   : > { %2942 = vmatmul.mubr.msk.f32.gmra.mrb[40].mxu1 %vm592_vm7, %v589_v48 }
  0x75   : > { %2924 = vmatmul.mubr.msk.f32.gmra.mrb[40].mxu0 %vm592_vm7, %v571_v49  ;;  %976 = vmatprep.mubr.f32.mxu1 %v5245_v1 }
  0x76   : > { %868 = vmatprep.mubr.f32.mxu0 %v5245_v1 }
  0x78   : > { %2943 = vmatmul.mubr.msk.f32.gmra.mrb[42].mxu1 %vm592_vm7, %v590_v50 }
  0x79   : > { %2925 = vmatmul.mubr.msk.f32.gmra.mrb[42].mxu0 %vm592_vm7, %v572_v51  ;;  %982 = vmatprep.mubr.f32.mxu1 %v5245_v1 }
  0x7a   : > { %874 = vmatprep.mubr.f32.mxu0 %v5245_v1 }
  0x7c   : > { %2944 = vmatmul.mubr.msk.f32.gmra.mrb[44].mxu1 %vm592_vm7, %v591_v52 }
  0x7d   : > { %2926 = vmatmul.mubr.msk.f32.gmra.mrb[44].mxu0 %vm592_vm7, %v573_v53  ;;  %3196 = vmatprep.mubr.msk.f32.mxu1 %vm592_vm7, %v3747_v19 }
  0x7e   : > { %1743 = vmatprep.mubr.f32.mxu0 %v5245_v1 }
  0x80   : > { %3197 = vmatmul.mubr.msk.f32.vlgmr.msra.gmra.mrb[46].mxu1 %vm592_vm7, %v3759_v21 }
  0x81   : > { %3199 = vmatprep.mubr.msk.f32.mxu1 %vm592_vm7, %v3773_v23 }
  0x84   : > { %3200 = vmatmul.mubr.msk.f32.gmra.mrb[48].mxu1 %vm592_vm7, %v3785_v25 }
  0x85   : > { %3202 = vmatprep.mubr.msk.f32.mxu1 %vm592_vm7, %v3797_v27 }
  0x88   : > { %3203 = vmatmul.mubr.msk.f32.gmra.mrb[50].mxu1 %vm592_vm7, %v3809_v29 }
  0x89   : > { %3205 = vmatprep.mubr.msk.f32.mxu1 %vm592_vm7, %v3821_v31 }
  0x8c   : > { %3206 = vmatmul.mubr.msk.f32.gmra.mrb[52].mxu1 %vm592_vm7, %v3833_v33 }
  0x8d   : > { %3208 = vmatprep.mubr.msk.f32.mxu1 %vm592_vm7, %v3845_v35 }
  0x90   : > { %3209 = vmatmul.mubr.msk.f32.gmra.mrb[54].mxu1 %vm592_vm7, %v565_v37 }
  0x91   : > { %3211 = vmatprep.mubr.msk.f32.mxu1 %vm592_vm7, %v566_v39 }
  0x94   : > { %3212 = vmatmul.mubr.msk.f32.gmra.mrb[56].mxu1 %vm592_vm7, %v567_v41 }
  0x95   : > { %3214 = vmatprep.mubr.msk.f32.mxu1 %vm592_vm7, %v568_v43 }
  0x98   : > { %3215 = vmatmul.mubr.msk.f32.gmra.mrb[58].mxu1 %vm592_vm7, %v569_v45 }
  0x99   : > { %3217 = vmatprep.mubr.msk.f32.mxu1 %vm592_vm7, %v570_v47 }
  0x9c   : > { %3218 = vmatmul.mubr.msk.f32.gmra.mrb[60].mxu1 %vm592_vm7, %v571_v49 }
  0x9d   : > { %3220 = vmatprep.mubr.msk.f32.mxu1 %vm592_vm7, %v572_v51 }
  0xa0   : > { %3221 = vmatmul.mubr.msk.f32.gmra.mrb[62].mxu1 %vm592_vm7, %v573_v53 }
  0xa1   : > { %3223 = vmatprep.mubr.msk.f32.mxu1 %vm592_vm7, %v3743_v18 }
  0xa4   : > { %3224 = vmatmul.mubr.msk.f32.gmra.mrb[64].mxu1 %vm592_vm7, %v3755_v20 }
  0xa5   : > { %3226 = vmatprep.mubr.msk.f32.mxu1 %vm592_vm7, %v3769_v22 }
  0xa8   : > { %3227 = vmatmul.mubr.msk.f32.gmra.mrb[66].mxu1 %vm592_vm7, %v3781_v24 }
  0xa9   : > { %3229 = vmatprep.mubr.msk.f32.mxu1 %vm592_vm7, %v3793_v26 }
  0xac   : > { %3230 = vmatmul.mubr.msk.f32.gmra.mrb[68].mxu1 %vm592_vm7, %v3805_v28 }
  0xad   : > { %3232 = vmatprep.mubr.msk.f32.mxu1 %vm592_vm7, %v3817_v30 }
  0xb0   : > { %3233 = vmatmul.mubr.msk.f32.gmra.mrb[70].mxu1 %vm592_vm7, %v3829_v32 }
  0xb1   : > { %3235 = vmatprep.mubr.msk.f32.mxu1 %vm592_vm7, %v3841_v34  ;;  %v1234_v34 = vlaneseq }
  0xb3   : > { %v1235_v39 = vshrl.u32 %v1234_v34, 7 }
  0xb4   : > { %3236 = vmatmul.mubr.msk.f32.gmra.mrb[72].mxu1 %vm592_vm7, %v3853_v36 }
  0xb5   : > { %3238 = vmatprep.mubr.msk.f32.mxu1 %vm592_vm7, %v3862_v38  ;;  %v4076_v47 = vsub.s32 5, %v1235_v39  ;;  %v4084_v51 = vsub.s32 6, %v1235_v39  ;;  %v4088_v53 = vsub.s32 2, %v1235_v39 }
  0xb7   : > { %5320 = vst [vmem:[#allocation14_spill] sm:$0xff] %v4076_v47  ;;  %5323 = vst [vmem:[#allocation17_spill] sm:$0xff] %v4084_v51  ;;  %v4114_v1 = vrot.slane %v3667_v3, %v4076_v47  ;;  %v4148_v5 = vrot.slane %v3670_v4, %v4088_v53 }
  0xb8   : > { %3239 = vmatmul.mubr.msk.f32.gmra.mrb[74].mxu1 %vm592_vm7, %v3871_v40  ;;  %5324 = vst [vmem:[#allocation18_spill] sm:$0xff] %v4088_v53 }
  0xb9   : > { %3241 = vmatprep.mubr.msk.f32.mxu1 %vm592_vm7, %v3880_v42  ;;  %5331 = vst [vmem:[#allocation25_spill] sm:$0xff] %v4114_v1  ;;  %5340 = vst [vmem:[#allocation34_spill] sm:$0xff] %v4148_v5 }
  0xbc   : > { %3242 = vmatmul.mubr.msk.f32.gmra.mrb[76].mxu1 %vm592_vm7, %v587_v44  ;;  %v4070_v44 = vsub.s32 4, %v1235_v39 }
  0xbd   : > { %3244 = vmatprep.mubr.msk.f32.mxu1 %vm592_vm7, %v588_v46  ;;  %v4074_v46 = vsub.s32 0, %v1235_v39 }
  0xbe   : > { %5318 = vst [vmem:[#allocation12_spill] sm:$0xff] %v4070_v44  ;;  %v4110_v0 = vrot.slane %v3670_v4, %v4070_v44 }
  0xbf   : > { %5319 = vst [vmem:[#allocation13_spill] sm:$0xff] %v4074_v46  ;;  %v4106_v34 = vrot.slane %v3670_v4, %v4074_v46 }
  0xc0   : > { %3245 = vmatmul.mubr.msk.f32.gmra.mrb[78].mxu1 %vm592_vm7, %v589_v48  ;;  %5330 = vst [vmem:[#allocation24_spill] sm:$0xff] %v4110_v0 }
  0xc1   : > { %3247 = vmatprep.mubr.msk.f32.mxu1 %vm592_vm7, %v590_v50  ;;  %v4082_v50 = vsub.s32 1, %v1235_v39  ;;  %5329 = vst [vmem:[#allocation23_spill] sm:$0xff] %v4106_v34 }
  0xc3   : > { %5322 = vst [vmem:[#allocation16_spill] sm:$0xff] %v4082_v50 }
  0xc4   : > { %3248 = vmatmul.mubr.msk.f32.gmra.mrb[80].mxu1 %vm592_vm7, %v591_v52 }
  0xc5   : > { %3258 = vmatprep.mubr.msk.f32.mxu1 %vm1570_vm8, %v3984_v54 }
  0xf7   : > { %v3988_v55 = vpop.f32.mrb[0].mxu1 }
  0xf8   : > { %5313 = vst [vmem:[#allocation7_spill] sm:$0xff] %v3988_v55  ;;  %v3179_v56 = vpop.f32.mrb[1].mxu1  ;;  %v4130_v55 = vrot.slane %v3670_v4, %v4082_v50 }
  0xf9   : > { %v4090_v56 = vsub.s32 7, %v1235_v39 }
  0xfa   : > { %5335 = vst [vmem:[#allocation29_spill] sm:$0xff] %v4130_v55 }
  0xfb   : > { %v3990_v57 = vpop.f32.mrb[2].mxu1  ;;  %5325 = vst [vmem:[#allocation19_spill] sm:$0xff] %v4090_v56 }
  0xfc   : > { %5314 = vst [vmem:[#allocation8_spill] sm:$0xff] %v3990_v57  ;;  %v3182_v58 = vpop.f32.mrb[3].mxu1  ;;  %v4134_v57 = vrot.slane %v3667_v3, %v4084_v51 }
  0xfd   : > { %v4094_v58 = vrot.slane %v3667_v3, %v4070_v44 }
  0xfe   : > { %5336 = vst [vmem:[#allocation30_spill] sm:$0xff] %v4134_v57 }
  0xff   : > { %v3992_v59 = vpop.f32.mrb[4].mxu1  ;;  %5326 = vst [vmem:[#allocation20_spill] sm:$0xff] %v4094_v58 }
 0x100   : > { %5315 = vst [vmem:[#allocation9_spill] sm:$0xff] %v3992_v59  ;;  %v3185_v60 = vpop.f32.mrb[5].mxu1  ;;  %v4122_v59 = vrot.slane %v3670_v4, %v4076_v47  ;;  %v4144_v47 = vrot.slane %v3667_v3, %v4088_v53 }
 0x102   : > { %5333 = vst [vmem:[#allocation27_spill] sm:$0xff] %v4122_v59  ;;  %5339 = vst [vmem:[#allocation33_spill] sm:$0xff] %v4144_v47 }
 0x103   : > { %v3994_v61 = vpop.f32.mrb[6].mxu1 }
 0x104   : > { %5316 = vst [vmem:[#allocation10_spill] sm:$0xff] %v3994_v61  ;;  %v3188_v62 = vpop.f32.mrb[7].mxu1  ;;  %v4126_v61 = vrot.slane %v3667_v3, %v4082_v50  ;;  %v4152_v50 = vrot.slane %v3667_v3, %v4090_v56 }
 0x105   : > { %v4098_v62 = vsub.s32 3, %v1235_v39 }
 0x106   : > { %5334 = vst [vmem:[#allocation28_spill] sm:$0xff] %v4126_v61  ;;  %5341 = vst [vmem:[#allocation35_spill] sm:$0xff] %v4152_v50 }
 0x107   : > { %v3996_v63 = vpop.f32.mrb[8].mxu1  ;;  %5327 = vst [vmem:[#allocation21_spill] sm:$0xff] %v4098_v62  ;;  %v4170_v53 = vrot.slane %v3670_v4, %v4098_v62 }
 0x108   : > { %5317 = vst [vmem:[#allocation11_spill] sm:$0xff] %v3996_v63  ;;  %v3191_v2 = vpop.f32.mrb[9].mxu1 }
 0x109   : > { %v4102_v2 = vrot.slane %v3667_v3, %v4074_v46  ;;  %v4140_v46 = vrot.slane %v3670_v4, %v4084_v51  ;;  %v4160_v51 = vrot.slane %v3670_v4, %v4090_v56  ;;  %5345 = vst [vmem:[#allocation39_spill] sm:$0xff] %v4170_v53 }
 0x10b   : > { %v3998_v6 = vpop.f32.mrb[10].mxu1  ;;  %5328 = vst [vmem:[#allocation22_spill] sm:$0xff] %v4102_v2  ;;  %5338 = vst [vmem:[#allocation32_spill] sm:$0xff] %v4140_v46 }
 0x10c   : > { %v4000_v7 = vpop.f32.mrb[10].mxu0  ;;  %v4002_v8 = vpop.f32.mrb[11].mxu1  ;;  %v4156_v54 = vmul.f32 %v4094_v58, %v3998_v6  ;;  %5343 = vst [vmem:[#allocation37_spill] sm:$0xff] %v4160_v51 }
 0x10d   : > { %v4004_v9 = vpop.f32.mrb[11].mxu0  ;;  %v4182_v56 = vmul.f32 %v4110_v0, %v4002_v8 }
 0x10e   : > { %5342 = vst [vmem:[#allocation36_spill] sm:$0xff] %v4156_v54  ;;  %v4178_v6 = vmul.f32 %v4106_v34, %v4004_v9 }
 0x10f   : > { %v4006_v10 = vpop.f32.mrb[12].mxu1  ;;  %5346 = vst [vmem:[#allocation40_spill] sm:$0xff] %v4182_v56 }
 0x110   : > { %v4008_v11 = vpop.f32.mrb[12].mxu0  ;;  %v4010_v12 = vpop.f32.mrb[13].mxu1 }
 0x111   : > { %v4012_v13 = vpop.f32.mrb[13].mxu0  ;;  %v4202_v8 = vmul.f32 %v4110_v0, %v4010_v12 }
 0x112   : > { %v4198_v9 = vmul.f32 %v4106_v34, %v4012_v13 }
 0x113   : > { %v4014_v14 = vpop.f32.mrb[14].mxu1  ;;  %5348 = vst [vmem:[#allocation42_spill] sm:$0xff] %v4202_v8 }
 0x114   : > { %v4016_v15 = vpop.f32.mrb[14].mxu0  ;;  %v4018_v16 = vpop.f32.mrb[15].mxu1 }
 0x115   : > { %v4020_v17 = vpop.f32.mrb[15].mxu0  ;;  %v1415_v13 = vmul.f32 %v4122_v59, %v4018_v16 }
 0x117   : > { %v4022_v18 = vpop.f32.mrb[16].mxu1 }
 0x118   : > { %v4024_v19 = vpop.f32.mrb[16].mxu0  ;;  %v4026_v20 = vpop.f32.mrb[17].mxu1  ;;  %v1417_v12 = vmul.f32 %v4114_v1, %v4022_v18 }
 0x119   : > { %v4028_v21 = vpop.f32.mrb[17].mxu0  ;;  %v4222_v8 = vmul.f32 %v4102_v2, %v4024_v19 }
 0x11b   : > { %v4030_v22 = vpop.f32.mrb[18].mxu1 }
 0x11c   : > { %v4032_v23 = vpop.f32.mrb[18].mxu0  ;;  %v4034_v24 = vpop.f32.mrb[19].mxu1 }
 0x11d   : > { %v4036_v25 = vpop.f32.mrb[19].mxu0  ;;  %v1282_v16 = vmul.f32 %v4126_v61, %v4032_v23  ;;  %v4242_v19 = vmul.f32 %v4122_v59, %v4034_v24 }
 0x11e   : > { %v1283_v18 = vmul.f32 %v4130_v55, %v4036_v25 }
 0x11f   : > { %v4038_v26 = vpop.f32.mrb[20].mxu1 }
 0x120   : > { %v4040_v27 = vpop.f32.mrb[20].mxu0  ;;  %v4042_v28 = vpop.f32.mrb[21].mxu1 }
 0x121   : > { %v4044_v29 = vpop.f32.mrb[21].mxu0  ;;  %v4256_v25 = vmul.f32 %v4122_v59, %v4042_v28 }
 0x122   : > { %v1286_v23 = vmul.f32 %v4130_v55, %v4044_v29 }
 0x123   : > { %v4046_v30 = vpop.f32.mrb[22].mxu1 }
 0x124   : > { %v4048_v31 = vpop.f32.mrb[22].mxu0  ;;  %v4050_v32 = vpop.f32.mrb[23].mxu1 }
 0x125   : > { %v4052_v33 = vpop.f32.mrb[23].mxu0 }
 0x126   : > { %v1289_v28 = vmul.f32 %v4130_v55, %v4052_v33 }
 0x127   : > { %v4054_v35 = vpop.f32.mrb[24].mxu1 }
 0x128   : > { %v4056_v36 = vpop.f32.mrb[24].mxu0  ;;  %v4058_v37 = vpop.f32.mrb[25].mxu1 }
 0x129   : > { %v4060_v38 = vpop.f32.mrb[25].mxu0 }
 0x12b   : > { %v4062_v40 = vpop.f32.mrb[26].mxu1 }
 0x12c   : > { %v4064_v41 = vpop.f32.mrb[26].mxu0  ;;  %v4066_v42 = vpop.f32.mrb[27].mxu1  ;;  %v4288_v33 = vmul.f32 %v4134_v57, %v4062_v40 }
 0x12d   : > { %v4068_v43 = vpop.f32.mrb[27].mxu0 }
 0x12f   : > { %v4072_v45 = vpop.f32.mrb[28].mxu1 }
 0x130   : > { %v4078_v48 = vpop.f32.mrb[28].mxu0  ;;  %v4080_v49 = vpop.f32.mrb[29].mxu1 }
 0x131   : > { %5321 = vst [vmem:[#allocation15_spill] sm:$0xff] %v4080_v49  ;;  %v4086_v52 = vpop.f32.mrb[29].mxu0 }
 0x133   : > { %v4096_v60 = vpop.f32.mrb[30].mxu1 }
 0x134   : > { %v4116_v63 = vpop.f32.mrb[30].mxu0  ;;  %v4118_v39 = vpop.f32.mrb[31].mxu1 }
 0x135   : > { %5332 = vst [vmem:[#allocation26_spill] sm:$0xff] %v4116_v63  ;;  %v4136_v44 = vpop.f32.mrb[31].mxu0  ;;  %v4174_v63 = vmul.f32 %v4102_v2, %v4000_v7  ;;  %v4194_v7 = vmul.f32 %v4102_v2, %v4008_v11  ;;  %v4214_v11 = vmul.f32 %v4106_v34, %v4020_v17  ;;  %v4232_v17 = vmul.f32 %v4114_v1, %v4030_v22 }
 0x136   : > { %5337 = vst [vmem:[#allocation31_spill] sm:$0xff] %v4136_v44  ;;  %v4166_v44 = vrot.slane %v3667_v3, %v4098_v62  ;;  %v4186_v3 = vmul.f32 %v4094_v58, %v4006_v10  ;;  %v1414_v10 = vmul.f32 %v4114_v1, %v4014_v14  ;;  %v4226_v14 = vmul.f32 %v4106_v34, %v4028_v21 }
 0x137   : > { %v4162_v49 = vpop.f32.mrb[32].mxu1  ;;  %v4246_v21 = vmul.f32 %v4114_v1, %v4038_v26  ;;  %v1285_v22 = vmul.f32 %v4126_v61, %v4040_v27  ;;  %v1288_v26 = vmul.f32 %v4126_v61, %v4048_v31  ;;  %v4263_v1 = vmul.f32 %v4134_v57, %v4046_v30 }
 0x138   : > { %5344 = vst [vmem:[#allocation38_spill] sm:$0xff] %v4166_v44  ;;  %5347 = vst [vmem:[#allocation41_spill] sm:$0xff] %v4186_v3  ;;  %v4188_v54 = vpop.f32.mrb[32].mxu0  ;;  %v4190_v4 = vpop.f32.mrb[33].mxu1  ;;  %v4210_v3 = vmul.f32 %v4102_v2, %v4016_v15  ;;  %v1418_v15 = vmul.f32 %v4122_v59, %v4026_v20  ;;  %v4267_v27 = vmul.f32 %v4140_v46, %v4050_v32 }
 0x139   : > { %v4206_v62 = vpop.f32.mrb[33].mxu0  ;;  %5349 = vst [vmem:[#allocation43_spill] sm:$0xff] %v4226_v14  ;;  %v4276_v59 = vmul.f32 %v4134_v57, %v4054_v35  ;;  %v1292_v30 = vmul.f32 %v4130_v55, %v4060_v38  ;;  %v4284_v32 = vmul.f32 %v4140_v46, %v4058_v37  ;;  %v1306_v35 = vmul.f32 %v4144_v47, %v4064_v41 }
 0x13a   : > { %v4299_v37 = vmul.f32 %v4140_v46, %v4066_v42  ;;  %v1487_v40 = vmul.f32 %v4160_v51, %v4118_v39  ;;  %v1307_v41 = vmul.f32 %v4148_v5, %v4068_v43  ;;  %v1309_v42 = vmul.f32 %v4144_v47, %v4078_v48 }
 0x13b   : > { %v4234_v56 = vpop.f32.mrb[34].mxu1  ;;  %5350 = vst [vmem:[#allocation44_spill] sm:$0xff] %v4276_v59  ;;  %5351 = vst [vmem:[#allocation45_spill] sm:$0xff] %v4284_v32  ;;  %v1489_v43 = vmul.f32 %v4152_v50, %v4162_v49 }
 0x13c   : > { %v846_v20 = vpop.f32.mrb[34].mxu0  ;;  %v4248_v34 = vpop.f32.mrb[35].mxu1 }
 0x13d   : > { %v1342_v24 = vmul.f32 %v4166_v44, %v846_v20  ;;  %v848_v2 = vpop.f32.mrb[35].mxu0  ;;  %v1291_v20 = vmul.f32 %v4126_v61, %v4056_v36 }
 0x13e   : > { %v1343_v29 = vmul.f32 %v4170_v53, %v848_v2 }
 0x13f   : > { %v1354_v31 = vadd.f32 %v1342_v24, %v1282_v16  ;;  %v4278_v14 = vpop.f32.mrb[36].mxu1  ;;  %v1486_v16 = vmul.f32 %v4152_v50, %v4096_v60  ;;  %v4308_v60 = vmul.f32 %v4134_v57, %v4072_v45 }
 0x140   : > { %v1355_v2 = vadd.f32 %v1343_v29, %v1283_v18  ;;  %v852_v36 = vpop.f32.mrb[36].mxu0  ;;  %v4290_v61 = vpop.f32.mrb[37].mxu1 }
 0x141   : > { %v1426_v24 = vadd.f32 %v1414_v10, %v1354_v31  ;;  %v1345_v38 = vmul.f32 %v4166_v44, %v852_v36  ;;  %v854_v55 = vpop.f32.mrb[37].mxu0 }
 0x142   : > { %v1427_v18 = vadd.f32 %v1415_v13, %v1355_v2  ;;  %v1346_v29 = vmul.f32 %v4170_v53, %v854_v55 }
 0x143   : > { %v4310_v10 = vadd.f32 %v1486_v16, %v1426_v24  ;;  %v1357_v31 = vadd.f32 %v1345_v38, %v1285_v22  ;;  %v966_v36 = vpop.f32.mrb[38].mxu1  ;;  %v1490_v24 = vmul.f32 %v4160_v51, %v4190_v4 }
 0x144   : > { %v4314_v32 = vadd.f32 %v1487_v40, %v1427_v18  ;;  %v1358_v39 = vadd.f32 %v1346_v29, %v1286_v23  ;;  %v1258_v13 = vadd.f32 %v4174_v63, %v966_v36  ;;  %v858_v55 = vpop.f32.mrb[38].mxu0  ;;  %v968_v2 = vpop.f32.mrb[39].mxu1  ;;  %v1310_v63 = vmul.f32 %v4148_v5, %v4086_v52  ;;  %v5352_v29 = vld [vmem:[#allocation26_spill] sm:$0xff] }
 0x145   : > { %v1429_v59 = vadd.f32 %v1417_v12, %v1357_v31  ;;  %v1348_v45 = vmul.f32 %v4166_v44, %v858_v55  ;;  %v1259_v16 = vadd.f32 %v4178_v6, %v968_v2  ;;  %v860_v22 = vpop.f32.mrb[39].mxu0  ;;  %v1312_v31 = vmul.f32 %v4144_v47, %v5352_v29  ;;  %v5353_v2 = vld [vmem:[#allocation31_spill] sm:$0xff] }
 0x146   : > { %v1430_v48 = vadd.f32 %v1418_v15, %v1358_v39  ;;  %v1318_v38 = vadd.f32 %v1306_v35, %v1258_v13  ;;  %v1349_v23 = vmul.f32 %v4170_v53, %v860_v22  ;;  %v1492_v39 = vmul.f32 %v4152_v50, %v4234_v56 }
 0x147   : > { %v4326_v40 = vadd.f32 %v1489_v43, %v1429_v59  ;;  %v1360_v18 = vadd.f32 %v1348_v45, %v1288_v26  ;;  %v1319_v49 = vadd.f32 %v1307_v41, %v1259_v16  ;;  %v972_v12 = vpop.f32.mrb[40].mxu1  ;;  %v1493_v13 = vmul.f32 %v4160_v51, %v4248_v34 }
 0x148   : > { %v4330_v6 = vadd.f32 %v1490_v24, %v1430_v48  ;;  %v1361_v36 = vadd.f32 %v1349_v23, %v1289_v28  ;;  %v1261_v4 = vadd.f32 %v4194_v7, %v972_v12  ;;  %v864_v15 = vpop.f32.mrb[40].mxu0  ;;  %v974_v35 = vpop.f32.mrb[41].mxu1  ;;  %v1313_v43 = vmul.f32 %v4148_v5, %v5353_v2 }
 0x149   : > { %v1432_v52 = vadd.f32 %v4232_v17, %v1360_v18  ;;  %v1351_v59 = vmul.f32 %v4166_v44, %v864_v15  ;;  %v1262_v26 = vadd.f32 %v4198_v9, %v974_v35  ;;  %v866_v41 = vpop.f32.mrb[41].mxu0  ;;  %v1315_v22 = vmul.f32 %v4144_v47, %v4188_v54  ;;  %v5354_v35 = vld [vmem:[#allocation36_spill] sm:$0xff] }
 0x14a   : > { %v1433_v55 = vadd.f32 %v4242_v19, %v1361_v36  ;;  %v1321_v28 = vadd.f32 %v1309_v42, %v1261_v4  ;;  %v1352_v7 = vmul.f32 %v4170_v53, %v866_v41  ;;  %v1495_v19 = vmul.f32 %v4152_v50, %v4278_v14 }
 0x14b   : > { %v1504_v45 = vadd.f32 %v1492_v39, %v1432_v52  ;;  %v1363_v56 = vadd.f32 %v1351_v59, %v1291_v20  ;;  %v1322_v16 = vadd.f32 %v1310_v63, %v1262_v26  ;;  %v978_v17 = vpop.f32.mrb[42].mxu1  ;;  %v1496_v12 = vmul.f32 %v4160_v51, %v4290_v61 }
 0x14c   : > { %v1505_v9 = vadd.f32 %v1493_v13, %v1433_v55  ;;  %v1364_v24 = vadd.f32 %v1352_v7, %v1292_v30  ;;  %v1264_v48 = vadd.f32 %v4210_v3, %v978_v17  ;;  %v870_v34 = vpop.f32.mrb[42].mxu0  ;;  %v980_v23 = vpop.f32.mrb[43].mxu1  ;;  %v1316_v29 = vmul.f32 %v4148_v5, %v4206_v62  ;;  %v5356_v13 = vld [vmem:[#allocation43_spill] sm:$0xff] }
 0x14d   : > { %v1435_v42 = vadd.f32 %v4246_v21, %v1363_v56  ;;  %v1378_v18 = vmul.f32 %v4094_v58, %v870_v34  ;;  %v1265_v20 = vadd.f32 %v4214_v11, %v980_v23  ;;  %v872_v63 = vpop.f32.mrb[43].mxu0 }
 0x14e   : > { %v1436_v54 = vadd.f32 %v4256_v25, %v1364_v24  ;;  %v1324_v30 = vadd.f32 %v1312_v31, %v1264_v48  ;;  %v1379_v3 = vmul.f32 %v4110_v0, %v872_v63  ;;  %v5355_v31 = vld [vmem:[#allocation40_spill] sm:$0xff]  ;;  %v5357_v48 = vld [vmem:[#allocation41_spill] sm:$0xff] }
 0x14f   : > { %v1507_v36 = vadd.f32 %v1495_v19, %v1435_v42  ;;  %v1390_v14 = vadd.f32 %v1378_v18, %v1318_v38  ;;  %v1325_v4 = vadd.f32 %v1313_v43, %v1265_v20  ;;  %v984_v21 = vpop.f32.mrb[44].mxu1  ;;  %v5359_v42 = vld [vmem:[#allocation44_spill] sm:$0xff]  ;;  %v5361_v63 = vld [vmem:[#allocation45_spill] sm:$0xff] }
 0x150   : > { %v1508_v15 = vadd.f32 %v1496_v12, %v1436_v54  ;;  %v1396_v39 = vadd.f32 %v5354_v35, %v1324_v30  ;;  %v1391_v11 = vadd.f32 %v1379_v3, %v1319_v49  ;;  %v1267_v52 = vadd.f32 %v4222_v8, %v984_v21  ;;  %v876_v59 = vpop.f32.mrb[44].mxu0  ;;  %v986_v61 = vpop.f32.mrb[45].mxu1 }
 0x151   : > { %v1462_v25 = vadd.f32 %v4263_v1, %v1390_v14  ;;  %v1397_v26 = vadd.f32 %v5355_v31, %v1325_v4  ;;  %v1381_v41 = vmul.f32 %v4094_v58, %v876_v59  ;;  %v1268_v62 = vadd.f32 %v5356_v13, %v986_v61  ;;  %v878_v55 = vpop.f32.mrb[45].mxu0 }
 0x152   : > { %v1468_v38 = vadd.f32 %v4288_v33, %v1396_v39  ;;  %v1463_v7 = vadd.f32 %v4267_v27, %v1391_v11  ;;  %v1327_v2 = vadd.f32 %v1315_v22, %v1267_v52  ;;  %v1382_v49 = vmul.f32 %v4110_v0, %v878_v55  ;;  %v5358_v27 = vld [vmem:[#allocation15_spill] sm:$0xff] }
 0x153   : > { %v1510_v8 = vadd.f32 %v4310_v10, %v1462_v25  ;;  %v1469_v43 = vadd.f32 %v4299_v37, %v1397_v26  ;;  %v1393_v56 = vadd.f32 %v1381_v41, %v1321_v28  ;;  %v1328_v1 = vadd.f32 %v1316_v29, %v1268_v62  ;;  %v4369_v17 = vpop.f32.mrb[46].mxu1  ;;  %v5360_v10 = vld [vmem:[#allocation42_spill] sm:$0xff]  ;;  %v4395_v62 = vld [vmem:[%s3981_s8 + $0x8] sm:$0xff] }
 0x154   : > { %v1516_v24 = vadd.f32 %v1504_v45, %v1468_v38  ;;  %v1399_v34 = vadd.f32 %v5357_v48, %v1327_v2  ;;  %v1394_v23 = vadd.f32 %v1382_v49, %v1322_v16  ;;  %v1511_v19 = vadd.f32 %v4314_v32, %v1463_v7  ;;  %v4373_v33 = vpop.f32.mrb[47].mxu1  ;;  %v5362_v41 = vld [vmem:[#allocation6_spill] sm:$0xff]  ;;  %v5364_v38 = vld [vmem:[#allocation16_spill] sm:$0xff]  ;;  %v5365_v7 = vld [vmem:[#allocation5_spill] sm:$0xff] }
 0x155   : > { %v1460_v22 = vmul.f32 %v4140_v46, %v5358_v27  ;;  %v1465_v18 = vadd.f32 %v5359_v42, %v1393_v56  ;;  %v1400_v20 = vadd.f32 %v5360_v10, %v1328_v1  ;;  %v1517_v37 = vadd.f32 %v1505_v9, %v1469_v43  ;;  %v4413_v56 = vld [vmem:[%s3981_s8 + $0x10] sm:$0xff] }
 0x156   : > { %v1471_v28 = vadd.f32 %v4308_v60, %v1399_v34  ;;  %v1466_v12 = vadd.f32 %v5361_v63, %v1394_v23  ;;  %v1522_v29 = vmax.f32 %v1510_v8, 0.0  ;;  %v1528_v21 = vmax.f32 %v1516_v24, 0.0  ;;  %v5367_v8 = vld [vmem:[#allocation21_spill] sm:$0xff] }
 0x157   : > { %v1513_v45 = vadd.f32 %v4326_v40, %v1465_v18  ;;  %v1472_v54 = vadd.f32 %v1460_v22, %v1400_v20  ;;  %v4382_v16 = vpop.f32.mrb[48].mxu1  ;;  %v1523_v9 = vmax.f32 %v1511_v19, 0.0  ;;  %v1529_v11 = vmax.f32 %v1517_v37, 0.0  ;;  %v4423_v22 = vld [vmem:[%s3981_s8 + $0x18] sm:$0xff] }
 0x158   : > { %v1519_v32 = vadd.f32 %v1507_v36, %v1471_v28  ;;  %v1514_v30 = vadd.f32 %v4330_v6, %v1466_v12  ;;  %v4385_v3 = vpop.f32.mrb[49].mxu1  ;;  %v5363_v13 = vmov 0.0   ;;  %v4401_v2 = vrot.slane %v5365_v7, %v5364_v38  ;;  %v4473_v38 = vld [vmem:[%s3981_s8 + $0x40] sm:$0xff] }
 0x159   : > { %v1525_v14 = vmax.f32 %v1513_v45, 0.0  ;;  %v1520_v4 = vadd.f32 %v1508_v15, %v1472_v54  ;;  %v4407_v43 = vrot.slane %v5365_v7, %v5367_v8  ;;  %v4433_v45 = vld [vmem:[%s3981_s8 + $0x20] sm:$0xff] }
 0x15a   : > { %v1531_v35 = vmax.f32 %v1519_v32, 0.0  ;;  %v1526_v39 = vmax.f32 %v1514_v30, 0.0  ;;  %5366 = vst [vmem:[#allocation26_spill] sm:$0xff] %v4401_v2 }
 0x15b   : > { %v3371_v60 = vpack.c.bf16 %v1525_v14, %v1522_v29  ;;  %v1532_v52 = vmax.f32 %v1520_v4, 0.0  ;;  %v3204_v40 = vpop.f32.mrb[50].mxu1  ;;  %5368 = vst [vmem:[#allocation31_spill] sm:$0xff] %v4407_v43  ;;  %v4443_v29 = vld [vmem:[%s3981_s8 + $0x28] sm:$0xff] }
 0x15c   : > { %v3369_v59 = vpack.c.bf16 %v1526_v39, %v1523_v9  ;;  %v3375_v61 = vpack.c.bf16 %v1531_v35, %v1528_v21  ;;  %v1075_v25 = vpop.f32.mrb[51].mxu1  ;;  %v1287_v24 = vmul.f32 %v3204_v40, %v4401_v2  ;;  %v5369_v21 = vld [vmem:[#allocation14_spill] sm:$0xff]  ;;  %v4457_v9 = vld [vmem:[%s3981_s8 + $0x30] sm:$0xff] }
 0x15d   : > { %v3373_v36 = vpack.c.bf16 %v1532_v52, %v1529_v11  ;;  %v1284_v23 = vmul.f32 %v4401_v2, %v1075_v25  ;;  %v4451_v35 = vrot.slane %v5365_v7, %v5369_v21 }
 0x15e   : > { %3370 = vmatprep.subr.bf16.mxu0 %v3369_v59  ;;  %v4465_v59 = vld [vmem:[%s3981_s8 + $0x38] sm:$0xff] }
 0x15f   : > { %3372 = vmatpush1.bf16.msra.mxu0 %v3371_v60  ;;  %v3207_v6 = vpop.f32.mrb[52].mxu1  ;;  %5370 = vst [vmem:[#allocation36_spill] sm:$0xff] %v4451_v35 }
 0x160   : > { %3374 = vmatprep.subr.bf16.mxu0 %v3373_v36  ;;  %v1085_v31 = vpop.f32.mrb[53].mxu1  ;;  %v1293_v10 = vmul.f32 %v3207_v6, %v4401_v2 }
 0x161   : > { %v1290_v28 = vmul.f32 %v4401_v2, %v1085_v31 }
 0x163   : > { %3376 = vmatpush1.bf16.msra.mxu0 %v3375_v61  ;;  %v4387_v15 = vpop.f32.mrb[54].mxu1 }
 0x164   : > { %v4389_v26 = vpop.f32.mrb[55].mxu1 }
 0x166   : > { %2982 = vmatmul.mubr.msk.f32.vlgmr.msra.gmra.mrb[46].mxu0 %vm1570_vm8, %v5362_v41 }
 0x167   : > { %1749 = vmatprep.mubr.f32.mxu0 %v5363_v13  ;;  %v4397_v55 = vpop.f32.mrb[56].mxu1 }
 0x168   : > { %v4403_v49 = vpop.f32.mrb[57].mxu1 }
 0x16a   : > { %2983 = vmatmul.mubr.msk.f32.gmra.mrb[48].mxu0 %vm1570_vm8, %v4395_v62 }
 0x16b   : > { %1755 = vmatprep.mubr.f32.mxu0 %v5363_v13  ;;  %v3216_v1 = vpop.f32.mrb[58].mxu1 }
 0x16c   : > { %v1347_v48 = vmul.f32 %v3216_v1, %v4407_v43  ;;  %v1115_v34 = vpop.f32.mrb[59].mxu1 }
 0x16d   : > { %v1344_v19 = vmul.f32 %v4407_v43, %v1115_v34 }
 0x16e   : > { %2984 = vmatmul.mubr.msk.f32.gmra.mrb[50].mxu0 %vm1570_vm8, %v4413_v56  ;;  %v1359_v27 = vadd.f32 %v1347_v48, %v1287_v24  ;;  %v4479_v24 = vld [vmem:[%s3981_s8 + $0x48] sm:$0xff] }
 0x16f   : > { %1761 = vmatprep.mubr.f32.mxu0 %v5363_v13  ;;  %v1356_v42 = vadd.f32 %v1344_v19, %v1284_v23  ;;  %v3219_v18 = vpop.f32.mrb[60].mxu1  ;;  %v3476_v23 = vld [vmem:[%s3659_s11 + $0x10] sm:$0xff]  ;;  %v5371_v19 = vld [vmem:[#allocation19_spill] sm:$0xff] }
 0x170   : > { %v1353_v20 = vmul.f32 %v3219_v18, %v4407_v43  ;;  %v1125_v37 = vpop.f32.mrb[61].mxu1 }
 0x171   : > { %v1350_v63 = vmul.f32 %v4407_v43, %v1125_v37 }
 0x172   : > { %2985 = vmatmul.mubr.msk.f32.gmra.mrb[52].mxu0 %vm1570_vm8, %v4423_v22  ;;  %v1365_v12 = vadd.f32 %v1353_v20, %v1293_v10 }
 0x173   : > { %1767 = vmatprep.mubr.f32.mxu0 %v5363_v13  ;;  %v1362_v54 = vadd.f32 %v1350_v63, %v1290_v28  ;;  %v4435_v32 = vpop.f32.mrb[62].mxu1  ;;  %v5373_v28 = vld [vmem:[#allocation13_spill] sm:$0xff] }
 0x174   : > { %v4437_v30 = vpop.f32.mrb[63].mxu1  ;;  %v4498_v63 = vrot.slane %v3476_v23, %v5373_v28 }
 0x176   : > { %2986 = vmatmul.mubr.msk.f32.gmra.mrb[54].mxu0 %vm1570_vm8, %v4433_v45  ;;  %5374 = vst [vmem:[#allocation43_spill] sm:$0xff] %v4498_v63 }
 0x177   : > { %1773 = vmatprep.mubr.f32.mxu0 %v5363_v13  ;;  %v4445_v14 = vpop.f32.mrb[64].mxu1 }
 0x178   : > { %v4447_v4 = vpop.f32.mrb[65].mxu1 }
 0x17a   : > { %2987 = vmatmul.mubr.msk.f32.gmra.mrb[56].mxu0 %vm1570_vm8, %v4443_v29 }
 0x17b   : > { %1779 = vmatprep.mubr.f32.mxu0 %v5363_v13  ;;  %v3228_v39 = vpop.f32.mrb[66].mxu1 }
 0x17c   : > { %v1419_v60 = vmul.f32 %v3228_v39, %v4451_v35  ;;  %v1155_v11 = vpop.f32.mrb[67].mxu1  ;;  %v4504_v39 = vld [vmem:[%s3981_s8 + $0x58] sm:$0xff] }
 0x17d   : > { %v1416_v52 = vmul.f32 %v4451_v35, %v1155_v11 }
 0x17e   : > { %2988 = vmatmul.mubr.msk.f32.gmra.mrb[58].mxu0 %vm1570_vm8, %v4457_v9  ;;  %v1431_v40 = vadd.f32 %v1419_v60, %v1359_v27  ;;  %v4487_v27 = vrot.slane %v3476_v23, %v5371_v19  ;;  %v5375_v60 = vld [vmem:[#allocation18_spill] sm:$0xff]  ;;  %v1248_v19 = vmul.f32 %v4498_v63, %v4373_v33  ;;  %v1257_v33 = vmul.f32 %v4382_v16, %v4498_v63 }
 0x17f   : > { %1785 = vmatprep.mubr.f32.mxu0 %v5363_v13  ;;  %v1428_v61 = vadd.f32 %v1416_v52, %v1356_v42  ;;  %v3231_v25 = vpop.f32.mrb[68].mxu1  ;;  %v4493_v42 = vld [vmem:[%s3981_s8 + $0x50] sm:$0xff]  ;;  %v4507_v11 = vrot.slane %v3476_v23, %v5375_v60 }
 0x180   : > { %v1425_v36 = vmul.f32 %v3231_v25, %v4451_v35  ;;  %v1165_v6 = vpop.f32.mrb[69].mxu1  ;;  %5372 = vst [vmem:[#allocation40_spill] sm:$0xff] %v4487_v27 }
 0x181   : > { %v1422_v31 = vmul.f32 %v4451_v35, %v1165_v6  ;;  %5376 = vst [vmem:[#allocation41_spill] sm:$0xff] %v4507_v11  ;;  %v1251_v6 = vmul.f32 %v4369_v17, %v4498_v63  ;;  %v1311_v17 = vmul.f32 %v4387_v15, %v4507_v11  ;;  %v1308_v60 = vmul.f32 %v4507_v11, %v4389_v26  ;;  %v4543_v26 = vld [vmem:[%s3981_s8 + $0x68] sm:$0xff] }
 0x182   : > { %2989 = vmatmul.mubr.msk.f32.gmra.mrb[60].mxu0 %vm1570_vm8, %v4465_v59  ;;  %v1437_v41 = vadd.f32 %v1425_v36, %v1365_v12  ;;  %v1254_v15 = vmul.f32 %v4498_v63, %v4385_v3  ;;  %v1317_v16 = vmul.f32 %v4397_v55, %v4507_v11  ;;  %v1314_v3 = vmul.f32 %v4507_v11, %v4403_v49  ;;  %v4559_v49 = vld [vmem:[%s3981_s8 + $0x70] sm:$0xff] }
 0x183   : > { %1791 = vmatprep.mubr.f32.mxu0 %v5363_v13  ;;  %v1434_v7 = vadd.f32 %v1422_v31, %v1362_v54  ;;  %v3234_v8 = vpop.f32.mrb[70].mxu1  ;;  %v5377_v31 = vld [vmem:[#allocation12_spill] sm:$0xff] }
 0x184   : > { %v1175_v1 = vpop.f32.mrb[71].mxu1 }
 0x186   : > { %2990 = vmatmul.mubr.msk.f32.gmra.mrb[62].mxu0 %vm1570_vm8, %v4473_v38 }
 0x187   : > { %1797 = vmatprep.mubr.f32.mxu0 %v5363_v13  ;;  %v4481_v48 = vpop.f32.mrb[72].mxu1 }
 0x188   : > { %v4483_v34 = vpop.f32.mrb[73].mxu1 }
 0x18a   : > { %2991 = vmatmul.mubr.msk.f32.gmra.mrb[64].mxu0 %vm1570_vm8, %v4479_v24 }
 0x18b   : > { %1803 = vmatprep.mubr.f32.mxu0 %v5363_v13  ;;  %v3240_v18 = vpop.f32.mrb[74].mxu1 }
 0x18c   : > { %v1491_v10 = vmul.f32 %v3240_v18, %v4487_v27  ;;  %v1195_v20 = vpop.f32.mrb[75].mxu1 }
 0x18d   : > { %v1488_v37 = vmul.f32 %v4487_v27, %v1195_v20  ;;  %v4522_v20 = vld [vmem:[%s3981_s8 + $0x60] sm:$0xff] }
 0x18e   : > { %2992 = vmatmul.mubr.msk.f32.gmra.mrb[66].mxu0 %vm1570_vm8, %v4493_v42  ;;  %v1503_v12 = vadd.f32 %v1491_v10, %v1431_v40  ;;  %v4514_v40 = vrot.slane %v3476_v23, %v5377_v31 }
 0x18f   : > { %v1500_v54 = vadd.f32 %v1488_v37, %v1428_v61  ;;  %v3243_v21 = vpop.f32.mrb[76].mxu1  ;;  %1809 = vmatprep.mubr.f32.mxu0 %v5363_v13  ;;  %v5379_v37 = vld [vmem:[#allocation17_spill] sm:$0xff] }
 0x190   : > { %v1497_v52 = vmul.f32 %v3243_v21, %v4487_v27  ;;  %v1205_v25 = vpop.f32.mrb[77].mxu1  ;;  %5378 = vst [vmem:[#allocation15_spill] sm:$0xff] %v4514_v40  ;;  %v4527_v28 = vrot.slane %v3476_v23, %v5379_v37  ;;  %v1380_v23 = vmul.f32 %v4514_v40, %v4437_v30  ;;  %v1386_v55 = vmul.f32 %v4514_v40, %v4447_v4 }
 0x191   : > { %v1494_v36 = vmul.f32 %v4487_v27, %v1205_v25 }
 0x192   : > { %v1509_v61 = vadd.f32 %v1497_v52, %v1437_v41  ;;  %2993 = vmatmul.mubr.msk.f32.gmra.mrb[68].mxu0 %vm1570_vm8, %v4504_v39  ;;  %5380 = vst [vmem:[#allocation44_spill] sm:$0xff] %v4527_v28  ;;  %v1452_v30 = vmul.f32 %v4527_v28, %v1175_v1  ;;  %v1461_v1 = vmul.f32 %v4481_v48, %v4527_v28 }
 0x193   : > { %v1506_v18 = vadd.f32 %v1494_v36, %v1434_v7  ;;  %v3246_v10 = vpop.f32.mrb[78].mxu1  ;;  %1815 = vmatprep.mubr.f32.mxu0 %v5363_v13  ;;  %v1383_v7 = vmul.f32 %v4435_v32, %v4514_v40  ;;  %v1455_v32 = vmul.f32 %v3234_v8, %v4527_v28 }
 0x194   : > { %v1263_v41 = vadd.f32 %v3246_v10, %v1251_v6  ;;  %v1215_v21 = vpop.f32.mrb[79].mxu1 }
 0x195   : > { %v1260_v52 = vadd.f32 %v1248_v19, %v1215_v21 }
 0x196   : > { %v1323_v25 = vadd.f32 %v1311_v17, %v1263_v41  ;;  %2994 = vmatmul.mubr.msk.f32.gmra.mrb[70].mxu0 %vm1570_vm8, %v4522_v20  ;;  %v1389_v41 = vmul.f32 %v4445_v14, %v4514_v40 }
 0x197   : > { %v1320_v36 = vadd.f32 %v1308_v60, %v1260_v52  ;;  %v3249_v6 = vpop.f32.mrb[80].mxu1  ;;  %1821 = vmatprep.mubr.f32.mxu0 %v5363_v13 }
 0x198   : > { %v1395_v31 = vadd.f32 %v1383_v7, %v1323_v25  ;;  %v1269_v19 = vadd.f32 %v3249_v6, %v1257_v33  ;;  %v1225_v10 = vpop.f32.mrb[81].mxu1  ;;  %v1458_v7 = vmul.f32 %v4527_v28, %v4483_v34  ;;  %v1549_v6 = vld [vmem:[%s3981_s8 + $0x78] sm:$0xff] }
 0x199   : > { %v1392_v17 = vadd.f32 %v1380_v23, %v1320_v36  ;;  %v1266_v37 = vadd.f32 %v1254_v15, %v1225_v10  ;;  %v1552_v10 = vld [vmem:[%s3981_s8 + $0x90] sm:$0xff] }
 0x19a   : > { %v1467_v21 = vadd.f32 %v1455_v32, %v1395_v31  ;;  %v1329_v60 = vadd.f32 %v1317_v16, %v1269_v19  ;;  %2995 = vmatmul.mubr.msk.f32.gmra.mrb[72].mxu0 %vm1570_vm8, %v4543_v26 }
 0x19b   : > { %v1464_v8 = vadd.f32 %v1452_v30, %v1392_v17  ;;  %v1326_v52 = vadd.f32 %v1314_v3, %v1266_v37  ;;  %1827 = vmatprep.mubr.f32.mxu0 %v5363_v13  ;;  %v1553_v3 = vld [vmem:[%s3981_s8 + $0x98] sm:$0xff]  ;;  %v1567_v30 = vld [vmem:[%s3981_s8 + $0x108] sm:$0xff]  ;;  %v1568_v17 = vld [vmem:[%s3981_s8 + $0x110] sm:$0xff] }
 0x19c   : > { %v1401_v33 = vadd.f32 %v1389_v41, %v1329_v60  ;;  %v1515_v14 = vadd.f32 %v1503_v12, %v1467_v21  ;;  %v1569_v37 = vld [vmem:[%s3981_s8 + $0x118] sm:$0xff] }
 0x19d   : > { %v1398_v25 = vadd.f32 %v1386_v55, %v1326_v52  ;;  %v1512_v15 = vadd.f32 %v1500_v54, %v1464_v8  ;;  %v1550_v54 = vld [vmem:[%s3981_s8 + $0x80] sm:$0xff] }
 0x19e   : > { %v1473_v23 = vadd.f32 %v1461_v1, %v1401_v33  ;;  %2996 = vmatmul.mubr.msk.f32.gmra.mrb[74].mxu0 %vm1570_vm8, %v4559_v49  ;;  %v1527_v4 = vmax.f32 %v1515_v14, 0.0 }
 0x19f   : > { %v1470_v36 = vadd.f32 %v1458_v7, %v1398_v25  ;;  %1833 = vmatprep.mubr.f32.mxu0 %v5363_v13  ;;  %v1524_v16 = vmax.f32 %v1512_v15, 0.0 }
 0x1a0   : > { %v1521_v48 = vadd.f32 %v1509_v61, %v1473_v23  ;;  %v1551_v61 = vld [vmem:[%s3981_s8 + $0x88] sm:$0xff] }
 0x1a1   : > { %v3377_v32 = vpack.c.bf16 %v1527_v4, %v1524_v16  ;;  %v1518_v12 = vadd.f32 %v1506_v18, %v1470_v36  ;;  %v5381_v18 = vmov 0.0|0.0  }
 0x1a2   : > { %2997 = vmatmul.mubr.msk.f32.gmra.mrb[76].mxu0 %vm1570_vm8, %v1549_v6  ;;  %v1533_v34 = vmax.f32 %v1521_v48, 0.0 }
 0x1a3   : > { %3378 = vmatprep.subr.bf16.mxu1 %v3377_v32  ;;  %1839 = vmatprep.mubr.f32.mxu0 %v5363_v13  ;;  %v1530_v31 = vmax.f32 %v1518_v12, 0.0 }
 0x1a4   : > { %3380 = vmatpush3.bf16.msra.mxu1 %v3377_v32 }
 0x1a5   : > { %v3381_v19 = vpack.c.bf16 %v1533_v34, %v1530_v31 }
 0x1a6   : > { %2998 = vmatmul.mubr.msk.f32.gmra.mrb[78].mxu0 %vm1570_vm8, %v1550_v54 }
 0x1a7   : > { %3382 = vmatprep.subr.bf16.mxu1 %v3381_v19  ;;  %1845 = vmatprep.mubr.f32.mxu0 %v5363_v13 }
 0x1a8   : > { %3384 = vmatpush3.bf16.msra.mxu1 %v3381_v19 }
 0x1a9   : > { %3393 = vmatprep.subr.bf16.mxu1 %v5381_v18 }
 0x1aa   : > { %2999 = vmatmul.mubr.msk.f32.gmra.mrb[80].mxu0 %vm1570_vm8, %v1551_v61 }
 0x1ab   : > { %3259 = vmatmul.mubr.msk.f32.vlgmr.msra.gmra.mrb[82].mxu1 %vm1570_vm8, %v4395_v62  ;;  %1851 = vmatprep.mubr.f32.mxu0 %v5363_v13  ;;  %v1554_v62 = vld [vmem:[%s3981_s8 + $0xa0] sm:$0xff] }
 0x1ac   : > { %3261 = vmatprep.mubr.msk.f32.mxu1 %vm1570_vm8, %v4413_v56  ;;  %v1555_v56 = vld [vmem:[%s3981_s8 + $0xa8] sm:$0xff] }
 0x1ae   : > { %3000 = vmatmul.mubr.msk.f32.gmra.mrb[82].mxu0 %vm1570_vm8, %v1552_v10 }
 0x1af   : > { %3262 = vmatmul.mubr.msk.f32.gmra.mrb[84].mxu1 %vm1570_vm8, %v4423_v22  ;;  %1857 = vmatprep.mubr.f32.mxu0 %v5363_v13  ;;  %v1556_v22 = vld [vmem:[%s3981_s8 + $0xb0] sm:$0xff] }
 0x1b0   : > { %3264 = vmatprep.mubr.msk.f32.mxu1 %vm1570_vm8, %v4433_v45  ;;  %v1557_v45 = vld [vmem:[%s3981_s8 + $0xb8] sm:$0xff] }
 0x1b2   : > { %3001 = vmatmul.mubr.msk.f32.gmra.mrb[84].mxu0 %vm1570_vm8, %v1553_v3 }
 0x1b3   : > { %3265 = vmatmul.mubr.msk.f32.gmra.mrb[86].mxu1 %vm1570_vm8, %v4443_v29  ;;  %1863 = vmatprep.mubr.f32.mxu0 %v5363_v13  ;;  %v1558_v29 = vld [vmem:[%s3981_s8 + $0xc0] sm:$0xff] }
 0x1b4   : > { %3267 = vmatprep.mubr.msk.f32.mxu1 %vm1570_vm8, %v4457_v9  ;;  %v1559_v9 = vld [vmem:[%s3981_s8 + $0xc8] sm:$0xff] }
 0x1b6   : > { %3002 = vmatmul.mubr.msk.f32.gmra.mrb[86].mxu0 %vm1570_vm8, %v1554_v62 }
 0x1b7   : > { %3268 = vmatmul.mubr.msk.f32.gmra.mrb[88].mxu1 %vm1570_vm8, %v4465_v59  ;;  %1869 = vmatprep.mubr.f32.mxu0 %v5363_v13  ;;  %v1560_v59 = vld [vmem:[%s3981_s8 + $0xd0] sm:$0xff] }
 0x1b8   : > { %3270 = vmatprep.mubr.msk.f32.mxu1 %vm1570_vm8, %v4473_v38  ;;  %v1561_v38 = vld [vmem:[%s3981_s8 + $0xd8] sm:$0xff] }
 0x1ba   : > { %3003 = vmatmul.mubr.msk.f32.gmra.mrb[88].mxu0 %vm1570_vm8, %v1555_v56 }
 0x1bb   : > { %3271 = vmatmul.mubr.msk.f32.gmra.mrb[90].mxu1 %vm1570_vm8, %v4479_v24  ;;  %1875 = vmatprep.mubr.f32.mxu0 %v5363_v13  ;;  %v1562_v24 = vld [vmem:[%s3981_s8 + $0xe0] sm:$0xff] }
 0x1bc   : > { %3273 = vmatprep.mubr.msk.f32.mxu1 %vm1570_vm8, %v4493_v42  ;;  %v1563_v42 = vld [vmem:[%s3981_s8 + $0xe8] sm:$0xff] }
 0x1be   : > { %3004 = vmatmul.mubr.msk.f32.gmra.mrb[90].mxu0 %vm1570_vm8, %v1556_v22 }
 0x1bf   : > { %3274 = vmatmul.mubr.msk.f32.gmra.mrb[92].mxu1 %vm1570_vm8, %v4504_v39  ;;  %1881 = vmatprep.mubr.f32.mxu0 %v5363_v13  ;;  %v1564_v39 = vld [vmem:[%s3981_s8 + $0xf0] sm:$0xff] }
 0x1c0   : > { %3276 = vmatprep.mubr.msk.f32.mxu1 %vm1570_vm8, %v4522_v20  ;;  %v1565_v20 = vld [vmem:[%s3981_s8 + $0xf8] sm:$0xff] }
 0x1c2   : > { %3005 = vmatmul.mubr.msk.f32.gmra.mrb[92].mxu0 %vm1570_vm8, %v1557_v45 }
 0x1c3   : > { %3277 = vmatmul.mubr.msk.f32.gmra.mrb[94].mxu1 %vm1570_vm8, %v4543_v26  ;;  %1887 = vmatprep.mubr.f32.mxu0 %v5363_v13  ;;  %v1566_v26 = vld [vmem:[%s3981_s8 + $0x100] sm:$0xff]  ;;  %s3481_s8 = sshll.u32 %s3561_s29, 4  ;;  %s3482_s8 = int_to_ptr.vmem [resolvable:$false] %s3481_s8 }
 0x1c4   : > { %3279 = vmatprep.mubr.msk.f32.mxu1 %vm1570_vm8, %v4559_v49  ;;  %s3483_s9 = scalar_lea.vmem %s3482_s8, 768  ;;  %p3484_p1 = scmp.lt.s32.totalorder %s5190_s16, %s3482_s8 }
 0x1c5   : > { %p3485_p2 = scmp.lt.s32.totalorder %s3483_s9, %s3477_s27 }
 0x1c6   : > { %3006 = vmatmul.mubr.msk.f32.gmra.mrb[94].mxu0 %vm1570_vm8, %v1558_v29 }
 0x1c7   : > { %3280 = vmatmul.mubr.msk.f32.gmra.mrb[96].mxu1 %vm1570_vm8, %v1549_v6  ;;  %1893 = vmatprep.mubr.f32.mxu0 %v5363_v13  ;;  %p3486_p3 = por %p3485_p2, %p3484_p1 }
 0x1c8   : > { %3282 = vmatprep.mubr.msk.f32.mxu1 %vm1570_vm8, %v1550_v54 }
 0x1c9   : > { %p3487_p5 = pnand %p3486_p3, %p3480_p0 }
 0x1ca   : > { %3007 = vmatmul.mubr.msk.f32.gmra.mrb[96].mxu0 %vm1570_vm8, %v1559_v9 }
 0x1cb   : > { %3283 = vmatmul.mubr.msk.f32.gmra.mrb[98].mxu1 %vm1570_vm8, %v1551_v61  ;;  %1899 = vmatprep.mubr.f32.mxu0 %v5363_v13  ;;  %v5382_v61 = vld [vmem:[#allocation28_spill] sm:$0xff] }
 0x1cc   : > { %3285 = vmatprep.mubr.msk.f32.mxu1 %vm1570_vm8, %v1552_v10 }
 0x1ce   : > { %3008 = vmatmul.mubr.msk.f32.gmra.mrb[98].mxu0 %vm1570_vm8, %v1560_v59 }
 0x1cf   : > { %3286 = vmatmul.mubr.msk.f32.gmra.mrb[100].mxu1 %vm1570_vm8, %v1553_v3  ;;  %1905 = vmatprep.mubr.f32.mxu0 %v5363_v13 }
 0x1d0   : > { %3288 = vmatprep.mubr.msk.f32.mxu1 %vm1570_vm8, %v1554_v62 }
 0x1d2   : > { %3009 = vmatmul.mubr.msk.f32.gmra.mrb[100].mxu0 %vm1570_vm8, %v1561_v38 }
 0x1d3   : > { %3289 = vmatmul.mubr.msk.f32.gmra.mrb[102].mxu1 %vm1570_vm8, %v1555_v56  ;;  %1911 = vmatprep.mubr.f32.mxu0 %v5363_v13  ;;  %v5383_v56 = vld [vmem:[#allocation29_spill] sm:$0xff] }
 0x1d4   : > { %3291 = vmatprep.mubr.msk.f32.mxu1 %vm1570_vm8, %v1556_v22 }
 0x1d6   : > { %3010 = vmatmul.mubr.msk.f32.gmra.mrb[102].mxu0 %vm1570_vm8, %v1562_v24 }
 0x1d7   : > { %3292 = vmatmul.mubr.msk.f32.gmra.mrb[104].mxu1 %vm1570_vm8, %v1557_v45  ;;  %1917 = vmatprep.mubr.f32.mxu0 %v5363_v13 }
 0x1d8   : > { %3294 = vmatprep.mubr.msk.f32.mxu1 %vm1570_vm8, %v1558_v29 }
 0x1da   : > { %3011 = vmatmul.mubr.msk.f32.gmra.mrb[104].mxu0 %vm1570_vm8, %v1563_v42 }
 0x1db   : > { %3295 = vmatmul.mubr.msk.f32.gmra.mrb[106].mxu1 %vm1570_vm8, %v1559_v9  ;;  %1923 = vmatprep.mubr.f32.mxu0 %v5363_v13 }
 0x1dc   : > { %3297 = vmatprep.mubr.msk.f32.mxu1 %vm1570_vm8, %v1560_v59 }
 0x1de   : > { %3012 = vmatmul.mubr.msk.f32.gmra.mrb[106].mxu0 %vm1570_vm8, %v1564_v39 }
 0x1df   : > { %3298 = vmatmul.mubr.msk.f32.gmra.mrb[108].mxu1 %vm1570_vm8, %v1561_v38  ;;  %1929 = vmatprep.mubr.f32.mxu0 %v5363_v13 }
 0x1e0   : > { %3300 = vmatprep.mubr.msk.f32.mxu1 %vm1570_vm8, %v1562_v24 }
 0x1e2   : > { %3013 = vmatmul.mubr.msk.f32.gmra.mrb[108].mxu0 %vm1570_vm8, %v1565_v20 }
 0x1e3   : > { %3301 = vmatmul.mubr.msk.f32.gmra.mrb[110].mxu1 %vm1570_vm8, %v1563_v42  ;;  %1935 = vmatprep.mubr.f32.mxu0 %v5363_v13 }
 0x1e4   : > { %3303 = vmatprep.mubr.msk.f32.mxu1 %vm1570_vm8, %v1564_v39 }
 0x1e6   : > { %3014 = vmatmul.mubr.msk.f32.gmra.mrb[0].mxu0 %vm1570_vm8, %v1566_v26 }
 0x1e7   : > { %3304 = vmatmul.mubr.msk.f32.gmra.mrb[112].mxu1 %vm1570_vm8, %v1565_v20  ;;  %1941 = vmatprep.mubr.f32.mxu0 %v5363_v13 }
 0x1e8   : > { %3306 = vmatprep.mubr.msk.f32.mxu1 %vm1570_vm8, %v1566_v26 }
 0x1ea   : > { %3015 = vmatmul.mubr.msk.f32.gmra.mrb[2].mxu0 %vm1570_vm8, %v1567_v30 }
 0x1eb   : > { %3307 = vmatmul.mubr.msk.f32.gmra.mrb[114].mxu1 %vm1570_vm8, %v1567_v30  ;;  %1947 = vmatprep.mubr.f32.mxu0 %v5363_v13 }
 0x1ec   : > { %3309 = vmatprep.mubr.msk.f32.mxu1 %vm1570_vm8, %v1568_v17 }
 0x1ee   : > { %3016 = vmatmul.mubr.msk.f32.gmra.mrb[4].mxu0 %vm1570_vm8, %v1568_v17 }
 0x1ef   : > { %3310 = vmatmul.mubr.msk.f32.gmra.mrb[116].mxu1 %vm1570_vm8, %v1569_v37  ;;  %1953 = vmatprep.mubr.f32.mxu0 %v5363_v13 }
 0x1f0   : > { %3320 = vmatprep.mubr.msk.f32.mxu1 %vm3558_vm0, %v5363_v13 }
 0x1f2   : > { %3017 = vmatmul.mubr.msk.f32.gmra.mrb[6].mxu0 %vm1570_vm8, %v1569_v37 }
 0x1f3   : > { %2521 = vmatprep.mubr.f32.mxu0 %v5363_v13 }
 0x239   : > { %v4683_v41 = vpop.f32.mrb[46].mxu0 }
 0x23a   : > { %v4685_v21 = vpop.f32.mrb[47].mxu0 }
 0x23d   : > { %v4687_v60 = vpop.f32.mrb[48].mxu0 }
 0x23e   : > { %v4689_v55 = vpop.f32.mrb[49].mxu0 }
 0x241   : > { %v4691_v8 = vpop.f32.mrb[50].mxu0 }
 0x242   : > { %v4693_v52 = vpop.f32.mrb[51].mxu0 }
 0x245   : > { %v4695_v49 = vpop.f32.mrb[52].mxu0 }
 0x246   : > { %v4697_v1 = vpop.f32.mrb[53].mxu0 }
 0x249   : > { %v1769_v33 = vpop.f32.mrb[54].mxu0 }
 0x24a   : > { %v1771_v14 = vpop.f32.mrb[55].mxu0  ;;  %v2241_v10 = vmul.f32 %v1769_v33, %v5382_v61 }
 0x24b   : > { %v2242_v22 = vmul.f32 %v1771_v14, %v5383_v56 }
 0x24d   : > { %v1775_v7 = vpop.f32.mrb[56].mxu0 }
 0x24e   : > { %v1777_v25 = vpop.f32.mrb[57].mxu0  ;;  %v2244_v38 = vmul.f32 %v1775_v7, %v5382_v61 }
 0x24f   : > { %v2245_v39 = vmul.f32 %v1777_v25, %v5383_v56 }
 0x251   : > { %v1781_v15 = vpop.f32.mrb[58].mxu0 }
 0x252   : > { %v1783_v23 = vpop.f32.mrb[59].mxu0  ;;  %v2247_v37 = vmul.f32 %v1781_v15, %v5382_v61 }
 0x255   : > { %v1787_v4 = vpop.f32.mrb[60].mxu0 }
 0x256   : > { %v1789_v36 = vpop.f32.mrb[61].mxu0 }
 0x259   : > { %v4699_v6 = vpop.f32.mrb[62].mxu0 }
 0x25a   : > { %v4701_v16 = vpop.f32.mrb[63].mxu0 }
 0x25d   : > { %v4703_v48 = vpop.f32.mrb[64].mxu0 }
 0x25e   : > { %v4705_v32 = vpop.f32.mrb[65].mxu0 }
 0x261   : > { %v4707_v12 = vpop.f32.mrb[66].mxu0 }
 0x262   : > { %v4709_v34 = vpop.f32.mrb[67].mxu0 }
 0x265   : > { %v4711_v54 = vpop.f32.mrb[68].mxu0 }
 0x266   : > { %v4713_v31 = vpop.f32.mrb[69].mxu0 }
 0x269   : > { %v1817_v19 = vpop.f32.mrb[70].mxu0 }
 0x26a   : > { %v2277_v3 = vmul.f32 %v1817_v19, %v4166_v44  ;;  %v1819_v62 = vpop.f32.mrb[71].mxu0  ;;  %v2248_v19 = vmul.f32 %v1783_v23, %v5383_v56 }
 0x26b   : > { %v2278_v45 = vmul.f32 %v1819_v62, %v4170_v53 }
 0x26c   : > { %v2289_v29 = vadd.f32 %v2277_v3, %v2241_v10 }
 0x26d   : > { %v2290_v9 = vadd.f32 %v2278_v45, %v2242_v22  ;;  %v1823_v59 = vpop.f32.mrb[72].mxu0  ;;  %v2250_v22 = vmul.f32 %v1787_v4, %v5382_v61 }
 0x26e   : > { %v2280_v24 = vmul.f32 %v1823_v59, %v4166_v44  ;;  %v1825_v42 = vpop.f32.mrb[73].mxu0  ;;  %v2251_v59 = vmul.f32 %v1789_v36, %v5383_v56  ;;  %v5388_v56 = vld [vmem:[#allocation27_spill] sm:$0xff] }
 0x26f   : > { %v2281_v20 = vmul.f32 %v1825_v42, %v4170_v53 }
 0x270   : > { %v2292_v26 = vadd.f32 %v2280_v24, %v2244_v38 }
 0x271   : > { %v2293_v30 = vadd.f32 %v2281_v20, %v2245_v39  ;;  %v1829_v17 = vpop.f32.mrb[74].mxu0 }
 0x272   : > { %v2283_v33 = vmul.f32 %v1829_v17, %v4166_v44  ;;  %v1831_v14 = vpop.f32.mrb[75].mxu0 }
 0x273   : > { %v2284_v10 = vmul.f32 %v1831_v14, %v4170_v53 }
 0x274   : > { %v2295_v7 = vadd.f32 %v2283_v33, %v2247_v37 }
 0x275   : > { %v2296_v3 = vadd.f32 %v2284_v10, %v2248_v19  ;;  %v1835_v62 = vpop.f32.mrb[76].mxu0 }
 0x276   : > { %v2286_v25 = vmul.f32 %v1835_v62, %v4166_v44  ;;  %v1837_v45 = vpop.f32.mrb[77].mxu0 }
 0x277   : > { %v2287_v38 = vmul.f32 %v1837_v45, %v4170_v53  ;;  %v5387_v45 = vld [vmem:[#allocation25_spill] sm:$0xff] }
 0x278   : > { %v2298_v15 = vadd.f32 %v2286_v25, %v2250_v22 }
 0x279   : > { %v2299_v24 = vadd.f32 %v2287_v38, %v2251_v59  ;;  %v4731_v42 = vpop.f32.mrb[78].mxu0 }
 0x27a   : > { %v4733_v39 = vpop.f32.mrb[79].mxu0 }
 0x27d   : > { %v4735_v23 = vpop.f32.mrb[80].mxu0 }
 0x27e   : > { %v4737_v20 = vpop.f32.mrb[81].mxu0  ;;  %v4739_v17 = vpop.f32.mrb[82].mxu1 }
 0x27f   : > { %v4741_v4 = vpop.f32.mrb[83].mxu1 }
 0x281   : > { %v4743_v37 = vpop.f32.mrb[82].mxu0 }
 0x282   : > { %v4745_v33 = vpop.f32.mrb[83].mxu0  ;;  %v4747_v36 = vpop.f32.mrb[84].mxu1 }
 0x283   : > { %v4749_v14 = vpop.f32.mrb[85].mxu1 }
 0x284   : > { %5384 = vst [vmem:[#allocation42_spill] sm:$0xff] %v4749_v14 }
 0x285   : > { %v4751_v19 = vpop.f32.mrb[84].mxu0 }
 0x286   : > { %5385 = vst [vmem:[#allocation45_spill] sm:$0xff] %v4751_v19  ;;  %v4753_v10 = vpop.f32.mrb[85].mxu0  ;;  %v3266_v62 = vpop.f32.mrb[86].mxu1 }
 0x287   : > { %5386 = vst [vmem:[#allocation6_spill] sm:$0xff] %v4753_v10  ;;  %v2046_v22 = vpop.f32.mrb[87].mxu1 }
 0x289   : > { %v1865_v25 = vpop.f32.mrb[86].mxu0 }
 0x28a   : > { %v2325_v59 = vmul.f32 %v1865_v25, %v5387_v45  ;;  %v1867_v38 = vpop.f32.mrb[87].mxu0  ;;  %v3269_v53 = vpop.f32.mrb[88].mxu1 }
 0x28b   : > { %v2326_v44 = vmul.f32 %v1867_v38, %v5388_v56  ;;  %v2056_v61 = vpop.f32.mrb[89].mxu1 }
 0x28c   : > { %v4757_v13 = vadd.f32 %v2325_v59, %v2289_v29 }
 0x28d   : > { %v4759_v18 = vadd.f32 %v2326_v44, %v2290_v9  ;;  %v1871_v28 = vpop.f32.mrb[88].mxu0 }
 0x28e   : > { %v2328_v40 = vmul.f32 %v1871_v28, %v5387_v45  ;;  %v1873_v46 = vpop.f32.mrb[89].mxu0  ;;  %v4762_v57 = vpop.f32.mrb[90].mxu1 }
 0x28f   : > { %5389 = vst [vmem:[#allocation16_spill] sm:$0xff] %v4762_v57  ;;  %v2329_v27 = vmul.f32 %v1873_v46, %v5388_v56  ;;  %v4765_v11 = vpop.f32.mrb[91].mxu1 }
 0x290   : > { %5390 = vst [vmem:[#allocation5_spill] sm:$0xff] %v4765_v11  ;;  %v4767_v25 = vadd.f32 %v2328_v40, %v2292_v26 }
 0x291   : > { %v4769_v10 = vadd.f32 %v2329_v27, %v2293_v30  ;;  %v1877_v38 = vpop.f32.mrb[90].mxu0 }
 0x292   : > { %v2331_v29 = vmul.f32 %v1877_v38, %v5387_v45  ;;  %v1879_v59 = vpop.f32.mrb[91].mxu0  ;;  %v4772_v44 = vpop.f32.mrb[92].mxu1  ;;  %v2246_v38 = vmul.f32 %v3266_v62, %v4401_v2  ;;  %v2252_v62 = vmul.f32 %v3269_v53, %v4401_v2 }
 0x293   : > { %5391 = vst [vmem:[#allocation21_spill] sm:$0xff] %v4772_v44  ;;  %v2332_v9 = vmul.f32 %v1879_v59, %v5388_v56  ;;  %v4775_v28 = vpop.f32.mrb[93].mxu1  ;;  %v2243_v59 = vmul.f32 %v2046_v22, %v4401_v2 }
 0x294   : > { %v4777_v19 = vadd.f32 %v2331_v29, %v2295_v7 }
 0x295   : > { %v4779_v57 = vadd.f32 %v2332_v9, %v2296_v3  ;;  %v1883_v46 = vpop.f32.mrb[92].mxu0 }
 0x296   : > { %v2334_v40 = vmul.f32 %v1883_v46, %v5387_v45  ;;  %v1885_v26 = vpop.f32.mrb[93].mxu0  ;;  %v3278_v27 = vpop.f32.mrb[94].mxu1 }
 0x297   : > { %v2335_v30 = vmul.f32 %v1885_v26, %v5388_v56  ;;  %v2282_v11 = vmul.f32 %v3278_v27, %v4407_v43  ;;  %v2086_v44 = vpop.f32.mrb[95].mxu1 }
 0x298   : > { %v4785_v14 = vadd.f32 %v2334_v40, %v2298_v15  ;;  %v2279_v7 = vmul.f32 %v2086_v44, %v4407_v43  ;;  %v2249_v15 = vmul.f32 %v2056_v61, %v4401_v2 }
 0x299   : > { %v4789_v3 = vadd.f32 %v2335_v30, %v2299_v24  ;;  %v4791_v29 = vpop.f32.mrb[94].mxu0  ;;  %v2294_v9 = vadd.f32 %v2282_v11, %v2246_v38 }
 0x29a   : > { %v4793_v46 = vpop.f32.mrb[95].mxu0  ;;  %v2291_v45 = vadd.f32 %v2279_v7, %v2243_v59  ;;  %v3281_v26 = vpop.f32.mrb[96].mxu1 }
 0x29b   : > { %v2288_v27 = vmul.f32 %v3281_v26, %v4407_v43  ;;  %v2096_v56 = vpop.f32.mrb[97].mxu1 }
 0x29c   : > { %v2285_v22 = vmul.f32 %v2096_v56, %v4407_v43 }
 0x29d   : > { %v4799_v40 = vpop.f32.mrb[96].mxu0  ;;  %v2300_v24 = vadd.f32 %v2288_v27, %v2252_v62 }
 0x29e   : > { %v4801_v44 = vpop.f32.mrb[97].mxu0  ;;  %v2297_v30 = vadd.f32 %v2285_v22, %v2249_v15  ;;  %v4803_v11 = vpop.f32.mrb[98].mxu1 }
 0x29f   : > { %5392 = vst [vmem:[#allocation14_spill] sm:$0xff] %v4803_v11  ;;  %v4805_v38 = vpop.f32.mrb[99].mxu1  ;;  %v5400_v11 = vld [vmem:[#allocation22_spill] sm:$0xff] }
 0x2a0   : > { %5393 = vst [vmem:[#allocation19_spill] sm:$0xff] %v4805_v38 }
 0x2a1   : > { %v4807_v59 = vpop.f32.mrb[98].mxu0 }
 0x2a2   : > { %5394 = vst [vmem:[#allocation13_spill] sm:$0xff] %v4807_v59  ;;  %v4809_v53 = vpop.f32.mrb[99].mxu0  ;;  %v4811_v7 = vpop.f32.mrb[100].mxu1 }
 0x2a3   : > { %5395 = vst [vmem:[#allocation18_spill] sm:$0xff] %v4809_v53  ;;  %5396 = vst [vmem:[#allocation12_spill] sm:$0xff] %v4811_v7  ;;  %v4813_v26 = vpop.f32.mrb[101].mxu1 }
 0x2a4   : > { %5397 = vst [vmem:[#allocation17_spill] sm:$0xff] %v4813_v26 }
 0x2a5   : > { %v4815_v61 = vpop.f32.mrb[100].mxu0 }
 0x2a6   : > { %5398 = vst [vmem:[#allocation46_spill] sm:$0xff] %v4815_v61  ;;  %v4817_v56 = vpop.f32.mrb[101].mxu0  ;;  %v3290_v62 = vpop.f32.mrb[102].mxu1 }
 0x2a7   : > { %5399 = vst [vmem:[#allocation47_spill] sm:$0xff] %v4817_v56  ;;  %v2330_v27 = vmul.f32 %v3290_v62, %v4451_v35  ;;  %v2126_v15 = vpop.f32.mrb[103].mxu1  ;;  %v4830_v62 = vmul.f32 %v4683_v41, %v5400_v11  ;;  %v4855_v41 = vmul.f32 %v4691_v8, %v5400_v11 }
 0x2a8   : > { %v2327_v22 = vmul.f32 %v2126_v15, %v4451_v35 }
 0x2a9   : > { %v1913_v43 = vpop.f32.mrb[102].mxu0  ;;  %v4821_v2 = vadd.f32 %v2330_v27, %v2294_v9  ;;  %v5401_v27 = vld [vmem:[#allocation23_spill] sm:$0xff] }
 0x2aa   : > { %v2373_v38 = vmul.f32 %v1913_v43, %v4152_v50  ;;  %v1915_v53 = vpop.f32.mrb[103].mxu0  ;;  %v4824_v59 = vadd.f32 %v2327_v22, %v2291_v45  ;;  %v3293_v7 = vpop.f32.mrb[104].mxu1  ;;  %v4838_v43 = vmul.f32 %v4685_v21, %v5401_v27  ;;  %v4842_v45 = vmul.f32 %v4687_v60, %v5400_v11 }
 0x2ab   : > { %v2374_v26 = vmul.f32 %v1915_v53, %v4160_v51  ;;  %v2336_v61 = vmul.f32 %v3293_v7, %v4451_v35  ;;  %v2136_v56 = vpop.f32.mrb[105].mxu1 }
 0x2ac   : > { %v4833_v15 = vadd.f32 %v2373_v38, %v4757_v13  ;;  %v2333_v9 = vmul.f32 %v2136_v56, %v4451_v35  ;;  %v4851_v13 = vmul.f32 %v4689_v55, %v5401_v27  ;;  %v4872_v55 = vmul.f32 %v4697_v1, %v5401_v27 }
 0x2ad   : > { %v4845_v53 = vadd.f32 %v2374_v26, %v4759_v18  ;;  %v1919_v7 = vpop.f32.mrb[104].mxu0  ;;  %v4847_v22 = vadd.f32 %v2336_v61, %v2300_v24  ;;  %v4864_v18 = vmul.f32 %v4693_v52, %v5401_v27  ;;  %v4868_v24 = vmul.f32 %v4695_v49, %v5400_v11  ;;  %v5411_v27 = vld [vmem:[#allocation41_spill] sm:$0xff]  ;;  %v5412_v11 = vld [vmem:[#allocation16_spill] sm:$0xff] }
 0x2ae   : > { %v2376_v21 = vmul.f32 %v1919_v7, %v4152_v50  ;;  %v1921_v38 = vpop.f32.mrb[105].mxu0  ;;  %v4858_v56 = vadd.f32 %v2333_v9, %v2297_v30  ;;  %v4860_v60 = vpop.f32.mrb[106].mxu1  ;;  %v2253_v30 = vmul.f32 %v4699_v6, %v4144_v47  ;;  %v4881_v61 = vmul.f32 %v4701_v16, %v4148_v5 }
 0x2af   : > { %v2377_v8 = vmul.f32 %v1921_v38, %v4160_v51  ;;  %v4875_v26 = vpop.f32.mrb[107].mxu1  ;;  %v4885_v52 = vmul.f32 %v4703_v48, %v4144_v47  ;;  %v4892_v1 = vmul.f32 %v4705_v32, %v4148_v5  ;;  %v4896_v9 = vmul.f32 %v4707_v12, %v4144_v47 }
 0x2b0   : > { %v4888_v49 = vadd.f32 %v2376_v21, %v4767_v25  ;;  %v4900_v6 = vmul.f32 %v4709_v34, %v4148_v5  ;;  %v4907_v25 = vmul.f32 %v4711_v54, %v4144_v47  ;;  %v4911_v32 = vmul.f32 %v4713_v31, %v4148_v5  ;;  %v5407_v47 = vld [vmem:[#allocation45_spill] sm:$0xff] }
 0x2b1   : > { %v4903_v16 = vadd.f32 %v2377_v8, %v4769_v10  ;;  %v1925_v48 = vpop.f32.mrb[106].mxu0  ;;  %v2301_v12 = vmul.f32 %v4731_v42, %v4094_v58  ;;  %v2302_v10 = vmul.f32 %v4733_v39, %v4110_v0  ;;  %v4922_v38 = vmul.f32 %v4735_v23, %v4094_v58 }
 0x2b2   : > { %5403 = vst [vmem:[#allocation49_spill] sm:$0xff] %v4911_v32  ;;  %v2379_v7 = vmul.f32 %v1925_v48, %v4152_v50  ;;  %v1927_v21 = vpop.f32.mrb[107].mxu0  ;;  %v4916_v34 = vpop.f32.mrb[108].mxu1  ;;  %v4926_v54 = vmul.f32 %v4737_v20, %v4110_v0  ;;  %v4933_v42 = vmul.f32 %v4743_v37, %v4094_v58  ;;  %v4937_v48 = vmul.f32 %v4739_v17, %v4498_v63  ;;  %v5405_v37 = vld [vmem:[#allocation42_spill] sm:$0xff]  ;;  %v5418_v32 = vld [vmem:[#allocation32_spill] sm:$0xff] }
 0x2b3   : > { %5402 = vst [vmem:[#allocation48_spill] sm:$0xff] %v4903_v16  ;;  %v2380_v31 = vmul.f32 %v1927_v21, %v4160_v51  ;;  %v4929_v8 = vpop.f32.mrb[109].mxu1  ;;  %v4941_v39 = vmul.f32 %v4741_v4, %v4498_v63  ;;  %v4948_v20 = vmul.f32 %v4745_v33, %v4110_v0  ;;  %v4952_v21 = vmul.f32 %v4747_v36, %v4498_v63 }
 0x2b4   : > { %5404 = vst [vmem:[#allocation50_spill] sm:$0xff] %v4929_v8  ;;  %v4944_v23 = vadd.f32 %v2379_v7, %v4777_v19  ;;  %v4956_v5 = vmul.f32 %v5405_v37, %v4498_v63  ;;  %v4963_v19 = vmul.f32 %v5407_v47, %v4094_v58  ;;  %v5409_v7 = vld [vmem:[#allocation6_spill] sm:$0xff]  ;;  %v4971_v36 = vmul.f32 %v5412_v11, %v5411_v27 }
 0x2b5   : > { %v4959_v17 = vadd.f32 %v2380_v31, %v4779_v57  ;;  %v1931_v4 = vpop.f32.mrb[108].mxu0  ;;  %v4967_v33 = vmul.f32 %v5409_v7, %v4110_v0  ;;  %v5413_v57 = vld [vmem:[#allocation5_spill] sm:$0xff]  ;;  %v5415_v7 = vld [vmem:[#allocation40_spill] sm:$0xff]  ;;  %v5416_v8 = vld [vmem:[#allocation30_spill] sm:$0xff] }
 0x2b6   : > { %5408 = vst [vmem:[#allocation45_spill] sm:$0xff] %v4963_v19  ;;  %v2382_v35 = vmul.f32 %v1931_v4, %v4152_v50  ;;  %v1933_v37 = vpop.f32.mrb[109].mxu0  ;;  %v3302_v63 = vpop.f32.mrb[110].mxu1  ;;  %v4976_v31 = vmul.f32 %v5413_v57, %v5411_v27  ;;  %v2349_v11 = vmul.f32 %v4791_v29, %v5416_v8  ;;  %v4988_v4 = vmul.f32 %v4775_v28, %v5411_v27 }
 0x2b7   : > { %5406 = vst [vmem:[#allocation42_spill] sm:$0xff] %v4959_v17  ;;  %5410 = vst [vmem:[#allocation6_spill] sm:$0xff] %v4967_v33  ;;  %v5414_v17 = vld [vmem:[#allocation21_spill] sm:$0xff]  ;;  %v2383_v58 = vmul.f32 %v1933_v37, %v4160_v51  ;;  %v2378_v0 = vmul.f32 %v3302_v63, %v5415_v7  ;;  %v2166_v33 = vpop.f32.mrb[111].mxu1  ;;  %v2352_v37 = vmul.f32 %v4799_v40, %v5416_v8 }
 0x2b8   : > { %v4980_v47 = vmul.f32 %v5414_v17, %v5411_v27  ;;  %v4991_v50 = vadd.f32 %v2382_v35, %v4785_v14  ;;  %v2375_v57 = vmul.f32 %v2166_v33, %v5415_v7  ;;  %v2350_v17 = vmul.f32 %v4793_v46, %v5418_v32  ;;  %v5421_v35 = vld [vmem:[#allocation15_spill] sm:$0xff]  ;;  %v5422_v14 = vld [vmem:[#allocation14_spill] sm:$0xff] }
 0x2b9   : > { %v4999_v63 = vadd.f32 %v2383_v58, %v4789_v3  ;;  %v1937_v51 = vpop.f32.mrb[0].mxu0  ;;  %v5002_v29 = vadd.f32 %v2378_v0, %v4821_v2  ;;  %v2353_v28 = vmul.f32 %v4801_v44, %v5418_v32  ;;  %v2306_v27 = vmul.f32 %v5422_v14, %v5421_v35  ;;  %v5424_v58 = vld [vmem:[#allocation13_spill] sm:$0xff]  ;;  %v5425_v0 = vld [vmem:[#allocation19_spill] sm:$0xff]  ;;  %v5426_v14 = vld [vmem:[#allocation18_spill] sm:$0xff] }
 0x2ba   : > { %5417 = vst [vmem:[#allocation16_spill] sm:$0xff] %v4991_v50  ;;  %v2229_v33 = vadd.f32 %v4830_v62, %v1937_v51  ;;  %v1939_v50 = vpop.f32.mrb[1].mxu0  ;;  %v5010_v46 = vadd.f32 %v2375_v57, %v4824_v59  ;;  %v3305_v40 = vpop.f32.mrb[112].mxu1  ;;  %v5014_v3 = vmul.f32 %v5424_v58, %v5416_v8  ;;  %v2303_v2 = vmul.f32 %v5425_v0, %v5421_v35  ;;  %v5427_v62 = vld [vmem:[#allocation12_spill] sm:$0xff]  ;;  %v5428_v58 = vld [vmem:[#allocation46_spill] sm:$0xff]  ;;  %v5429_v0 = vld [vmem:[#allocation17_spill] sm:$0xff] }
 0x2bb   : > { %5419 = vst [vmem:[#allocation5_spill] sm:$0xff] %v4999_v63  ;;  %5420 = vst [vmem:[#allocation21_spill] sm:$0xff] %v5002_v29  ;;  %v2230_v63 = vadd.f32 %v4838_v43, %v1939_v50  ;;  %v2384_v44 = vmul.f32 %v3305_v40, %v5415_v7  ;;  %v2176_v29 = vpop.f32.mrb[113].mxu1  ;;  %v2356_v51 = vmul.f32 %v5426_v14, %v5418_v32  ;;  %v5430_v14 = vld [vmem:[#allocation47_spill] sm:$0xff] }
 0x2bc   : > { %5423 = vst [vmem:[#allocation32_spill] sm:$0xff] %v5010_v46  ;;  %v2312_v59 = vmul.f32 %v5427_v62, %v5421_v35  ;;  %v2265_v57 = vadd.f32 %v2253_v30, %v2229_v33  ;;  %v2381_v46 = vmul.f32 %v2176_v29, %v5415_v7  ;;  %v5027_v19 = vmul.f32 %v5428_v58, %v5416_v8 }
 0x2bd   : > { %v5031_v16 = vmul.f32 %v5429_v0, %v5421_v35  ;;  %v2266_v50 = vadd.f32 %v4881_v61, %v2230_v63  ;;  %v5035_v43 = vadd.f32 %v2384_v44, %v4847_v22  ;;  %v1943_v40 = vpop.f32.mrb[2].mxu0  ;;  %v5039_v62 = vmul.f32 %v5430_v14, %v5418_v32  ;;  %v5431_v0 = vld [vmem:[#allocation44_spill] sm:$0xff] }
 0x2be   : > { %v2313_v30 = vadd.f32 %v2301_v12, %v2265_v57  ;;  %v2232_v29 = vadd.f32 %v4842_v45, %v1943_v40  ;;  %v5043_v33 = vadd.f32 %v2381_v46, %v4858_v56  ;;  %v1945_v58 = vpop.f32.mrb[3].mxu0  ;;  %v3308_v8 = vpop.f32.mrb[114].mxu1  ;;  %v2354_v35 = vmul.f32 %v4860_v60, %v5431_v0  ;;  %v5432_v63 = vld [vmem:[#allocation8_spill] sm:$0xff]  ;;  %v5433_v57 = vld [vmem:[#allocation7_spill] sm:$0xff] }
 0x2bf   : > { %v2314_v61 = vadd.f32 %v2302_v10, %v2266_v50  ;;  %v2233_v22 = vadd.f32 %v4851_v13, %v1945_v58  ;;  %v2210_v44 = vadd.f32 %v3308_v8, %v5432_v63  ;;  %v2186_v7 = vpop.f32.mrb[115].mxu1  ;;  %v2351_v14 = vmul.f32 %v4875_v26, %v5431_v0 }
 0x2c0   : > { %v2361_v12 = vadd.f32 %v2349_v11, %v2313_v30  ;;  %v2268_v45 = vadd.f32 %v4885_v52, %v2232_v29  ;;  %v2207_v56 = vadd.f32 %v2186_v7, %v5433_v57  ;;  %v2360_v46 = vmul.f32 %v4916_v34, %v5431_v0 }
 0x2c1   : > { %v2362_v40 = vadd.f32 %v2350_v17, %v2314_v61  ;;  %v2269_v60 = vadd.f32 %v4892_v1, %v2233_v22  ;;  %v2234_v10 = vadd.f32 %v4937_v48, %v2210_v44  ;;  %v1949_v13 = vpop.f32.mrb[4].mxu0  ;;  %v5434_v1 = vld [vmem:[#allocation10_spill] sm:$0xff] }
 0x2c2   : > { %v2397_v8 = vadd.f32 %v4833_v15, %v2361_v12  ;;  %v2316_v50 = vadd.f32 %v4922_v38, %v2268_v45  ;;  %v2231_v26 = vadd.f32 %v4941_v39, %v2207_v56  ;;  %v2235_v11 = vadd.f32 %v4855_v41, %v1949_v13  ;;  %v1951_v52 = vpop.f32.mrb[5].mxu0  ;;  %v3311_v30 = vpop.f32.mrb[116].mxu1  ;;  %v5435_v12 = vld [vmem:[#allocation9_spill] sm:$0xff] }
 0x2c3   : > { %v2317_v7 = vadd.f32 %v4926_v54, %v2269_v60  ;;  %v2270_v34 = vadd.f32 %v4971_v36, %v2234_v10  ;;  %v2236_v17 = vadd.f32 %v4864_v18, %v1951_v52  ;;  %v2216_v29 = vadd.f32 %v3311_v30, %v5434_v1  ;;  %v2196_v48 = vpop.f32.mrb[117].mxu1  ;;  %v5436_v10 = vld [vmem:[#allocation48_spill] sm:$0xff] }
 0x2c4   : > { %v2409_v58 = vmax.f32 %v2397_v8, 0.0  ;;  %v2364_v61 = vadd.f32 %v2352_v37, %v2316_v50  ;;  %v2267_v15 = vadd.f32 %v4976_v31, %v2231_v26  ;;  %v2271_v38 = vadd.f32 %v4896_v9, %v2235_v11 }
 0x2c5   : > { %v2365_v39 = vadd.f32 %v2353_v28, %v2317_v7  ;;  %v2318_v22 = vadd.f32 %v2306_v27, %v2270_v34  ;;  %v2272_v41 = vadd.f32 %v4900_v6, %v2236_v17  ;;  %v2240_v63 = vadd.f32 %v4952_v21, %v2216_v29  ;;  %v1955_v54 = vpop.f32.mrb[6].mxu0  ;;  %v5443_v17 = vld [vmem:[#allocation42_spill] sm:$0xff]  ;;  %v5444_v29 = vld [vmem:[#allocation16_spill] sm:$0xff] }
 0x2c6   : > { %v2400_v36 = vadd.f32 %v4888_v49, %v2364_v61  ;;  %v2315_v44 = vadd.f32 %v2303_v2, %v2267_v15  ;;  %v2319_v18 = vadd.f32 %v4933_v42, %v2271_v38  ;;  %v2213_v45 = vadd.f32 %v2196_v48, %v5435_v12  ;;  %v1957_v57 = vpop.f32.mrb[7].mxu0  ;;  %v2421_v12 = vld [vmem:[%s5103_s12] sm:$0xff] }
 0x2c7   : > { %v2366_v37 = vadd.f32 %v2354_v35, %v2318_v22  ;;  %v2320_v31 = vadd.f32 %v4948_v20, %v2272_v41  ;;  %v2276_v9 = vadd.f32 %v4980_v47, %v2240_v63  ;;  %v2238_v27 = vadd.f32 %v4868_v24, %v1955_v54  ;;  %v5445_v41 = vld [vmem:[#allocation5_spill] sm:$0xff] }
 0x2c8   : > { %v2412_v28 = vmax.f32 %v2400_v36, 0.0  ;;  %v2363_v6 = vadd.f32 %v2351_v14, %v2315_v44  ;;  %v2367_v21 = vadd.f32 %v5014_v3, %v2319_v18  ;;  %v2237_v56 = vadd.f32 %v4956_v5, %v2213_v45  ;;  %v5437_v14 = vld [vmem:[#allocation45_spill] sm:$0xff] }
 0x2c9   : > { %v2368_v49 = vadd.f32 %v2356_v51, %v2320_v31  ;;  %v2324_v2 = vadd.f32 %v2312_v59, %v2276_v9  ;;  %v2274_v42 = vadd.f32 %v4907_v25, %v2238_v27  ;;  %v2239_v60 = vadd.f32 %v4872_v55, %v1957_v57  ;;  %v5438_v3 = vld [vmem:[#allocation49_spill] sm:$0xff]  ;;  %v5439_v51 = vld [vmem:[#allocation50_spill] sm:$0xff]  ;;  %v2422_v57 = vld [vmem:[%s5103_s12 + $0x8] sm:$0xff] }
 0x2ca   : > { %v2403_v35 = vadd.f32 %v4944_v23, %v2367_v21  ;;  %v2273_v20 = vadd.f32 %v4988_v4, %v2237_v56  ;;  %v2398_v47 = vadd.f32 %v4845_v53, %v2362_v40  ;;  %v2401_v24 = vadd.f32 %v5436_v10, %v2365_v39  ;;  %v5440_v4 = vld [vmem:[#allocation6_spill] sm:$0xff]  ;;  %v5441_v40 = vld [vmem:[#allocation32_spill] sm:$0xff]  ;;  %v2425_v9 = vld [vmem:[%s5103_s12 + $0x20] sm:$0xff] }
 0x2cb   : > { %v2372_v13 = vadd.f32 %v2360_v46, %v2324_v2  ;;  %v2322_v8 = vadd.f32 %v5437_v14, %v2274_v42  ;;  %v2275_v50 = vadd.f32 %v5438_v3, %v2239_v60  ;;  %v3387_v5 = vpack.c.bf16 %v2412_v28, %v2409_v58  ;;  %v5442_v46 = vld [vmem:[#allocation21_spill] sm:$0xff]  ;;  %v2424_v31 = vld [vmem:[%s5103_s12 + $0x18] sm:$0xff]  ;;  %v2426_v27 = vld [vmem:[%s5103_s12 + $0x28] sm:$0xff] }
 0x2cc   : > { %v2357_v59 = vmul.f32 %v5439_v51, %v5431_v0  ;;  %v2321_v25 = vadd.f32 %v5031_v16, %v2273_v20  ;;  %v2410_v55 = vmax.f32 %v2398_v47, 0.0  ;;  %v2413_v26 = vmax.f32 %v2401_v24, 0.0  ;;  %v2427_v28 = vld [vmem:[%s5103_s12 + $0x30] sm:$0xff]  ;;  %v2429_v21 = vld [vmem:[%s5103_s12 + $0x40] sm:$0xff]  ;;  %v5448_v3 = vld [vmem:[#allocation26_spill] sm:$0xff] }
 0x2cd   : > { %v2370_v23 = vadd.f32 %v5027_v19, %v2322_v8  ;;  %v2323_v53 = vadd.f32 %v5440_v4, %v2275_v50  ;;  %v2399_v11 = vadd.f32 %v5441_v40, %v2363_v6  ;;  %v2402_v52 = vadd.f32 %v5442_v46, %v2366_v37  ;;  %v2423_v37 = vld [vmem:[%s5103_s12 + $0x10] sm:$0xff]  ;;  %v2428_v6 = vld [vmem:[%s5103_s12 + $0x38] sm:$0xff] }
 0x2ce   : > { %v2369_v30 = vadd.f32 %v2357_v59, %v2321_v25  ;;  %v3385_v7 = vpack.c.bf16 %v2413_v26, %v2410_v55  ;;  %v2408_v34 = vadd.f32 %v5035_v43, %v2372_v13  ;;  %v2404_v1 = vadd.f32 %v5443_v17, %v2368_v49  ;;  %v5450_v55 = vld [vmem:[#allocation28_spill] sm:$0xff]  ;;  %v5452_v40 = vld [vmem:[#allocation29_spill] sm:$0xff] }
 0x2cf   : > { %v2406_v48 = vadd.f32 %v5444_v29, %v2370_v23  ;;  %v2371_v16 = vadd.f32 %v5039_v62, %v2323_v53  ;;  %v2411_v58 = vmax.f32 %v2399_v11, 0.0  ;;  %v2414_v61 = vmax.f32 %v2402_v52, 0.0  ;;  %v5451_v23 = vld [vmem:[#allocation38_spill] sm:$0xff]  ;;  %v5453_v52 = vld [vmem:[#allocation39_spill] sm:$0xff] }
 0x2d0   : > { %3386 = vmatprep.subr.bf16.mxu0 %v3385_v7  ;;  %v2405_v19 = vadd.f32 %v5043_v33, %v2369_v30  ;;  %v2420_v15 = vmax.f32 %v2408_v34, 0.0  ;;  %v2415_v38 = vmax.f32 %v2403_v35, 0.0  ;;  %v2416_v54 = vmax.f32 %v2404_v1, 0.0 }
 0x2d1   : > { %v2418_v39 = vmax.f32 %v2406_v48, 0.0  ;;  %3388 = vmatpush1.bf16.msra.mxu0 %v3387_v5  ;;  %v3394_v22 = vpack.c.bf16 %v2414_v61, %v2411_v58  ;;  %v2407_v63 = vadd.f32 %v5445_v41, %v2371_v16  ;;  %v5446_v18 = vmov 0.0|0.0   ;;  %v5449_v5 = vld [vmem:[#allocation31_spill] sm:$0xff]  ;;  %v5454_v58 = vld [vmem:[#allocation36_spill] sm:$0xff] }
 0x2d2   : > { %v2417_v43 = vmax.f32 %v2405_v19, 0.0  ;;  %v5447_v45 = vmov 0.0  }
 0x2d3   : > { %3395 = vmatpush3.bf16.msra.mxu1 %v3394_v22  ;;  %v2419_v36 = vmax.f32 %v2407_v63, 0.0  ;;  %v3391_v44 = vpack.c.bf16 %v2418_v39, %v2415_v38  ;;  %v5455_v38 = vld [vmem:[#allocation25_spill] sm:$0xff]  ;;  %v5456_v63 = vld [vmem:[#allocation27_spill] sm:$0xff] }
 0x2d4   : > { %3396 = vmatprep.subr.bf16.mxu1 %v5446_v18  ;;  %v3397_v62 = vpack.c.bf16 %v2420_v15, %v2417_v43 }
 0x2d5   : > { %v3389_v33 = vpack.c.bf16 %v2419_v36, %v2416_v54 }
 0x2d7   : > { %3398 = vmatpush3.bf16.msra.mxu1 %v3397_v62  ;;  %3390 = vmatprep.subr.bf16.mxu0 %v3389_v33 }
 0x2d8   : > { %3392 = vmatpush1.bf16.msra.mxu0 %v3391_v44 }
 0x2da   : > { %3321 = vmatmul.mubr.msk.f32.vlgmr.msra.gmra.mrb[118].mxu1 %vm1570_vm8, %v2421_v12 }
 0x2db   : > { %3054 = vmatmul.mubr.msk.f32.vlgmr.msra.gmra.mrb[110].mxu0 %vm1570_vm8, %v2421_v12  ;;  %3323 = vmatprep.mubr.msk.f32.mxu1 %vm3558_vm0, %v5447_v45 }
 0x2dc   : > { %2527 = vmatprep.mubr.f32.mxu0 %v5447_v45 }
 0x2de   : > { %3324 = vmatmul.mubr.msk.f32.gmra.mrb[120].mxu1 %vm1570_vm8, %v2422_v57 }
 0x2df   : > { %3055 = vmatmul.mubr.msk.f32.gmra.mrb[112].mxu0 %vm1570_vm8, %v2422_v57  ;;  %3326 = vmatprep.mubr.msk.f32.mxu1 %vm3558_vm0, %v5447_v45 }
 0x2e0   : > { %2533 = vmatprep.mubr.f32.mxu0 %v5447_v45 }
 0x2e2   : > { %3327 = vmatmul.mubr.msk.f32.gmra.mrb[122].mxu1 %vm1570_vm8, %v2423_v37 }
 0x2e3   : > { %3056 = vmatmul.mubr.msk.f32.gmra.mrb[114].mxu0 %vm1570_vm8, %v2423_v37  ;;  %3329 = vmatprep.mubr.msk.f32.mxu1 %vm3558_vm0, %v5447_v45 }
 0x2e4   : > { %2539 = vmatprep.mubr.f32.mxu0 %v5447_v45 }
 0x2e6   : > { %3330 = vmatmul.mubr.msk.f32.gmra.mrb[124].mxu1 %vm1570_vm8, %v2424_v31 }
 0x2e7   : > { %3057 = vmatmul.mubr.msk.f32.gmra.mrb[116].mxu0 %vm1570_vm8, %v2424_v31  ;;  %3332 = vmatprep.mubr.msk.f32.mxu1 %vm3558_vm0, %v5447_v45 }
 0x2e8   : > { %2545 = vmatprep.mubr.f32.mxu0 %v5447_v45 }
 0x2ea   : > { %3333 = vmatmul.mubr.msk.f32.gmra.mrb[126].mxu1 %vm1570_vm8, %v2425_v9 }
 0x2eb   : > { %3058 = vmatmul.mubr.msk.f32.gmra.mrb[118].mxu0 %vm1570_vm8, %v2425_v9  ;;  %3335 = vmatprep.mubr.msk.f32.mxu1 %vm3558_vm0, %v5447_v45  ;;  %v5458_v9 = vld [vmem:[#allocation35_spill] sm:$0xff] }
 0x2ec   : > { %2551 = vmatprep.mubr.f32.mxu0 %v5447_v45 }
 0x2ee   : > { %3336 = vmatmul.mubr.msk.f32.gmra.mrb[128].mxu1 %vm1570_vm8, %v2426_v27 }
 0x2ef   : > { %3059 = vmatmul.mubr.msk.f32.gmra.mrb[120].mxu0 %vm1570_vm8, %v2426_v27  ;;  %3338 = vmatprep.mubr.msk.f32.mxu1 %vm3558_vm0, %v5447_v45 }
 0x2f0   : > { %2557 = vmatprep.mubr.f32.mxu0 %v5447_v45 }
 0x2f2   : > { %3339 = vmatmul.mubr.msk.f32.gmra.mrb[130].mxu1 %vm1570_vm8, %v2427_v28 }
 0x2f3   : > { %3060 = vmatmul.mubr.msk.f32.gmra.mrb[122].mxu0 %vm1570_vm8, %v2427_v28  ;;  %3341 = vmatprep.mubr.msk.f32.mxu1 %vm3558_vm0, %v5447_v45 }
 0x2f4   : > { %2563 = vmatprep.mubr.f32.mxu0 %v5447_v45 }
 0x2f6   : > { %3342 = vmatmul.mubr.msk.f32.gmra.mrb[132].mxu1 %vm1570_vm8, %v2428_v6 }
 0x2f7   : > { %3061 = vmatmul.mubr.msk.f32.gmra.mrb[124].mxu0 %vm1570_vm8, %v2428_v6  ;;  %3344 = vmatprep.mubr.msk.f32.mxu1 %vm3558_vm0, %v5447_v45 }
 0x2f8   : > { %2569 = vmatprep.mubr.f32.mxu0 %v5447_v45  ;;  %v5457_v45 = vld [vmem:[#allocation40_spill] sm:$0xff] }
 0x2fa   : > { %3345 = vmatmul.mubr.msk.f32.gmra.mrb[134].mxu1 %vm1570_vm8, %v2429_v21 }
 0x2fb   : > { %3062 = vmatmul.mubr.msk.f32.gmra.mrb[8].mxu0 %vm1570_vm8, %v2429_v21  ;;  %v5459_v21 = vld [vmem:[#allocation37_spill] sm:$0xff] }
 0x3ad   : > { %v2642_v56 = vpop.f32.mrb[118].mxu1 }
 0x3ae   : > { %v3322_v49 = vpop.f32.mrb[119].mxu1  ;;  %v2523_v2 = vpop.f32.mrb[110].mxu0 }
 0x3af   : > { %v2525_v42 = vpop.f32.mrb[111].mxu0 }
 0x3b1   : > { %v2647_v60 = vpop.f32.mrb[120].mxu1 }
 0x3b2   : > { %v3325_v35 = vpop.f32.mrb[121].mxu1  ;;  %v2529_v20 = vpop.f32.mrb[112].mxu0  ;;  %v2697_v50 = vmul.f32 %v2647_v60, %v5448_v3  ;;  %v5460_v60 = vld [vmem:[#allocation22_spill] sm:$0xff]  ;;  %v5462_v3 = vld [vmem:[#allocation23_spill] sm:$0xff] }
 0x3b3   : > { %v2531_v47 = vpop.f32.mrb[113].mxu0  ;;  %v2695_v26 = vmul.f32 %v2529_v20, %v5450_v55  ;;  %v2689_v35 = vmul.f32 %v2523_v2, %v5460_v60  ;;  %v5466_v2 = vld [vmem:[#allocation34_spill] sm:$0xff] }
 0x3b4   : > { %v2696_v11 = vmul.f32 %v2531_v47, %v5452_v40  ;;  %v5465_v40 = vld [vmem:[#allocation41_spill] sm:$0xff] }
 0x3b5   : > { %v2652_v10 = vpop.f32.mrb[122].mxu1 }
 0x3b6   : > { %v3328_v24 = vpop.f32.mrb[123].mxu1  ;;  %v2535_v13 = vpop.f32.mrb[114].mxu0 }
 0x3b7   : > { %v2537_v14 = vpop.f32.mrb[115].mxu0  ;;  %v5461_v24 = vld [vmem:[#allocation43_spill] sm:$0xff] }
 0x3b9   : > { %v2657_v8 = vpop.f32.mrb[124].mxu1 }
 0x3ba   : > { %v2706_v51 = vmul.f32 %v2657_v8, %v5449_v5  ;;  %v3331_v59 = vpop.f32.mrb[125].mxu1  ;;  %v2541_v25 = vpop.f32.mrb[116].mxu0  ;;  %v2691_v8 = vmul.f32 %v2642_v56, %v5461_v24  ;;  %v5463_v5 = vld [vmem:[#allocation11_spill] sm:$0xff]  ;;  %v5467_v56 = vld [vmem:[#allocation20_spill] sm:$0xff] }
 0x3bb   : > { %v2704_v4 = vmul.f32 %v2541_v25, %v5451_v23  ;;  %v2543_v53 = vpop.f32.mrb[117].mxu0 }
 0x3bc   : > { %v2709_v46 = vadd.f32 %v2706_v51, %v2697_v50  ;;  %v2705_v30 = vmul.f32 %v2543_v53, %v5453_v52  ;;  %v2690_v50 = vmul.f32 %v2525_v42, %v5462_v3 }
 0x3bd   : > { %v2707_v7 = vadd.f32 %v2704_v4, %v2695_v26  ;;  %v2662_v34 = vpop.f32.mrb[126].mxu1  ;;  %v5464_v26 = vld [vmem:[#allocation33_spill] sm:$0xff] }
 0x3be   : > { %v2708_v17 = vadd.f32 %v2705_v30, %v2696_v11  ;;  %v3334_v1 = vpop.f32.mrb[127].mxu1  ;;  %v2547_v29 = vpop.f32.mrb[118].mxu0  ;;  %v2698_v23 = vmul.f32 %v2535_v13, %v5464_v26  ;;  %v2700_v11 = vmul.f32 %v2652_v10, %v5465_v40 }
 0x3bf   : > { %v2549_v48 = vpop.f32.mrb[119].mxu0  ;;  %v2710_v42 = vmul.f32 %v2547_v29, %v5467_v56 }
 0x3c1   : > { %v2667_v16 = vpop.f32.mrb[128].mxu1 }
 0x3c2   : > { %v2718_v61 = vmul.f32 %v2667_v16, %v5454_v58  ;;  %v3337_v19 = vpop.f32.mrb[129].mxu1  ;;  %v2553_v15 = vpop.f32.mrb[120].mxu0  ;;  %v5469_v16 = vld [vmem:[#allocation24_spill] sm:$0xff] }
 0x3c3   : > { %v2716_v39 = vmul.f32 %v2553_v15, %v5455_v38  ;;  %v2555_v22 = vpop.f32.mrb[121].mxu0  ;;  %v2711_v58 = vmul.f32 %v2549_v48, %v5469_v16  ;;  %v5470_v19 = vld [vmem:[#allocation30_spill] sm:$0xff] }
 0x3c4   : > { %v2721_v41 = vadd.f32 %v2718_v61, %v2709_v46  ;;  %v2717_v43 = vmul.f32 %v2555_v22, %v5456_v63  ;;  %v2699_v46 = vmul.f32 %v2537_v14, %v5466_v2 }
 0x3c5   : > { %v2719_v54 = vadd.f32 %v2716_v39, %v2707_v7  ;;  %v2672_v36 = vpop.f32.mrb[130].mxu1 }
 0x3c6   : > { %v2720_v44 = vadd.f32 %v2717_v43, %v2708_v17  ;;  %v3340_v18 = vpop.f32.mrb[131].mxu1  ;;  %v2559_v62 = vpop.f32.mrb[122].mxu0  ;;  %v5468_v17 = vld [vmem:[#allocation15_spill] sm:$0xff]  ;;  %v2724_v10 = vmul.f32 %v2672_v36, %v5431_v0 }
 0x3c7   : > { %v2561_v33 = vpop.f32.mrb[123].mxu0  ;;  %v2712_v1 = vmul.f32 %v2662_v34, %v5468_v17  ;;  %v2722_v15 = vmul.f32 %v2559_v62, %v5470_v19 }
 0x3c8   : > { %v2723_v14 = vmul.f32 %v2561_v33, %v5418_v32 }
 0x3c9   : > { %v2677_v12 = vpop.f32.mrb[132].mxu1 }
 0x3ca   : > { %v2730_v57 = vmul.f32 %v2677_v12, %v5457_v45  ;;  %v3343_v37 = vpop.f32.mrb[133].mxu1  ;;  %v2565_v31 = vpop.f32.mrb[124].mxu0 }
 0x3cb   : > { %v2728_v27 = vmul.f32 %v2565_v31, %v5458_v9  ;;  %v2567_v28 = vpop.f32.mrb[125].mxu0 }
 0x3cc   : > { %v2733_v6 = vadd.f32 %v2730_v57, %v2721_v41  ;;  %v2729_v49 = vmul.f32 %v2567_v28, %v5459_v21 }
 0x3cd   : > { %v2731_v20 = vadd.f32 %v2728_v27, %v2719_v54  ;;  %v2682_v47 = vpop.f32.mrb[134].mxu1 }
 0x3ce   : > { %v2688_v51 = vadd.f32 %v2682_v47, %v5463_v5  ;;  %v2732_v59 = vadd.f32 %v2729_v49, %v2720_v44  ;;  %v2571_v25 = vpop.f32.mrb[8].mxu0  ;;  %v3346_v55 = vpop.f32.mrb[135].mxu1 }
 0x3cf   : > { %v2692_v4 = vadd.f32 %v2689_v35, %v2571_v25  ;;  %v2573_v53 = vpop.f32.mrb[9].mxu0 }
 0x3d0   : > { %v2694_v52 = vadd.f32 %v2691_v8, %v2688_v51  ;;  %v2693_v30 = vadd.f32 %v2690_v50, %v2573_v53 }
 0x3d1   : > { %v2701_v7 = vadd.f32 %v2698_v23, %v2692_v4 }
 0x3d2   : > { %v2703_v61 = vadd.f32 %v2700_v11, %v2694_v52  ;;  %v2702_v13 = vadd.f32 %v2699_v46, %v2693_v30 }
 0x3d3   : > { %v2713_v38 = vadd.f32 %v2710_v42, %v2701_v7 }
 0x3d4   : > { %v2715_v39 = vadd.f32 %v2712_v1, %v2703_v61  ;;  %v2714_v22 = vadd.f32 %v2711_v58, %v2702_v13 }
 0x3d5   : > { %v2725_v41 = vadd.f32 %v2722_v15, %v2713_v38 }
 0x3d6   : > { %v2727_v63 = vadd.f32 %v2724_v10, %v2715_v39  ;;  %v2726_v29 = vadd.f32 %v2723_v14, %v2714_v22 }
 0x3d7   : > { %v2734_v43 = vadd.f32 %v2731_v20, %v2725_v41 }
 0x3d8   : > { %v2736_v34 = vadd.f32 %v2733_v6, %v2727_v63  ;;  %v2735_v48 = vadd.f32 %v2732_v59, %v2726_v29 }
 0x3d9   : > { %v2737_v54 = vadd.f32 1.0, %v2734_v43 }
 0x3da   : > { %v2738_v44 = vadd.f32 1.0, %v2735_v48  ;;  %v2739_v18 = vadd.f32 1.0, %v2736_v34 }
 0x3db   : > { %2740 = vst [vmem:[%s302_s15] sm:$0xff] %v2737_v54 }
 0x3dc   : > { %2741 = vst [vmem:[%s302_s15 + $0x8] sm:$0xff] %v2738_v44  ;;  %2742 = vst [vmem:[%s302_s15 + $0x10] sm:$0xff] %v2739_v18 }
 0x3dd   : > { %3490 = shalt.err (!%p3487_p5)
}
 0x3de   : > { %s3491_s10 = scalar_lea.hbm %s5188_s25, 384  ;;  %s3495_s7 = scalar_lea.hbm %s5242_s5, 768 }
 0x3df   : > { %p3492_p6 = scmp.ne.s32.totalorder %s5188_s25, %s3491_s10  ;;  %p3496_p10 = scmp.lt.u32.totalorder %s5188_s25, %s5242_s5 }
 0x3e0   : > { %p3497_p11 = scmp.lt.u32.totalorder %s3495_s7, %s3491_s10  ;;  %p3499_p13 = scmp.lt.u32.totalorder %s3491_s10, %s5188_s25 }
 0x3e1   : > { %p3493_p7 = pnand %p3492_p6, %p3632_p4 }
 0x3e2   : > { %p3498_p12 = por %p3497_p11, %p3496_p10 }
 0x3e3   : > { %p3494_p9 = pneg %p3493_p7 }
 0x3e4   : > { %p3500_p0 = por %p3499_p13, %p3498_p12 }
 0x3e6   : > { %p3501_p1 = pnand %p3500_p0, %p3494_p9 }
 0x3e8   : > { %3504 = shalt.err (!%p3501_p1)
}
 0x3e9   : > { %3417 = dma.vmem_to_hbm [thread:$0]  (%p3632_p4), %s5190_s16, 384, %s5188_s25, %s2744_s21  }
 0x3ea PF: > { %p3423_p2 = scmp.ge.s32.totalorder %s3555_s23, 2  ;;  %s2772_s15 = sand.u32 1, %s3535_s18  }
 0x3eb   : > { %s2773_s17 = scalar_lea.sflag [#allocation3], %s2772_s15 }
 0x3ec   : > { %p3420_p3 = pnand %p3423_p2, %p3639_p8 }
 0x3ee   : > { %3530 = dma.done.wait (!%p3420_p3), %s2773_s17, 384  }
 0x3ef   : > { %3532 = vsyncadd (!%p3420_p3), %s2773_s17, 4294966912  ;;  %s18_s23 = sadd.s32 1, %s3555_s23   ;;  %s5471_s18 = smov %s3539_s19 }
 0x3f0   : > { %p15_p5 = scmp.ge.s32.totalorder %s18_s23, 4   ;;  %s5472_s19 = smov %s3543_s20 }
 0x3f1   : > { %s5473_s20 = smov %s3645_s6  ;;  %s5474_s21 = smov %s3551_s22 }
 0x3f2   : > { %s5475_s22 = smov %s5477_s26  ;;  %17 = sbr.rel (!%p15_p5) target bundleno = 4 (0x4), region = 87 }
 0x3f9   :  { %2778 = vsyncpa [#allocation3], 1 }
 0x3fa   :  { %2780 = vsyncpa [#allocation3 + $0x1], 1 }

</bundles_post_ra>
